<compile_context>
chip_gen: v5e
topology: v5e:2x2
jax: 0.10.0
libtpu: 0.0.40
codegen_flags: <defaults>
</compile_context>

<pallas_src>
import functools

import jax
import jax.numpy as jnp
from jax.experimental import pallas as pl
from jax.experimental.pallas import tpu as pltpu


# ------------------------------ Pallas kernel ------------------------------ #

def _fused_encoder_kernel(adj_ref, invdeg_ref, dinv_ref, sdinv2_ref, x_ref,
                          wl0_ref, wr0_ref, b0_ref,
                          wl1_ref, wr1_ref, b1_ref,
                          wsh_ref, bsh_ref, whd_ref, bhd_ref,
                          out_ref):
    """Fused 2x SAGEConv + GCN_shared + (GCN_mu | GCN_logvar) forward.

    Inputs (pre-packed by the wrapper):
      adj    : bf16 [N, N]   unnormalized target-major edge counts
      invdeg : f32  [N, 1]   1 / max(in_degree, 1)          (mean aggregation)
      dinv   : f32  [N, 1]   rsqrt(gcn_degree)              (GCN norm)
      sdinv2 : f32  [N, 1]   needs_self_loop * dinv^2       (GCN self-loop term)
      x      : bf16 [N, Din]
      wl0,wr0: bf16 [Din, H]  (transposed)     b0 : f32 [1, H]
      wl1,wr1: bf16 [H,   H]  (transposed)     b1 : f32 [1, H]
      wsh    : bf16 [H, Dout] (transposed)     bsh: f32 [1, Dout]
      whd    : bf16 [H, 2*Dout] = [Wmu^T | Wlv^T]   bhd: f32 [1, 2*Dout]
    """
    bf16 = jnp.bfloat16
    mm = functools.partial(jnp.dot, preferred_element_type=jnp.float32)

    adj = adj_ref[...]
    inv_deg = invdeg_ref[...]
    dinv = dinv_ref[...]
    sdinv2 = sdinv2_ref[...]
    x = x_ref[...]

    # ---- SAGEConv 0: project-then-aggregate, split dots, ReLU ----
    xwl = mm(x, wl0_ref[...])                               # f32 [N, H]
    xwr = mm(x, wr0_ref[...])                               # f32 [N, H]
    agg = inv_deg * mm(adj, xwl.astype(bf16))               # A_mean @ (x Wl^T)
    h = jnp.maximum(agg + xwr + b0_ref[...], 0.0)
    # TODO(synk): feat_drop=0.5 dropout between SAGE layers omitted (eval mode).

    # ---- SAGEConv 1 (last layer: no activation / dropout) ----
    hb = h.astype(bf16)
    hwl = mm(hb, wl1_ref[...])
    hwr = mm(hb, wr1_ref[...])
    agg = inv_deg * mm(adj, hwl.astype(bf16))
    h = agg + hwr + b1_ref[...]                             # f32 [N, H]

    # ---- GCN shared + ReLU: relu(A_gcn @ (h @ Wsh^T) + bsh) ----
    hw = mm(h.astype(bf16), wsh_ref[...])                   # f32 [N, Dout]
    agg = dinv * mm(adj, (dinv * hw).astype(bf16))
    xg = jnp.maximum(agg + sdinv2 * hw + bsh_ref[...], 0.0)

    # ---- Fused heads: [mu | logvar] = A_gcn @ (xg @ [Wmu^T|Wlv^T]) + [bmu|blv]
    yw = mm(xg.astype(bf16), whd_ref[...])                  # f32 [N, 2*Dout]
    agg = dinv * mm(adj, (dinv * yw).astype(bf16))
    out_ref[...] = agg + sdinv2 * yw + bhd_ref[...]


# -------------------------------- Wrapper ---------------------------------- #

def fused_encoder(adj, inv_deg, dinv, sdinv2, x, packed):
    n = x.shape[0]
    d2 = packed[-1].shape[1]  # 2 * D_out  (mu | logvar concatenated)
    h_dim = packed[0].shape[1]
    vmem = pl.BlockSpec(memory_space=pltpu.MemorySpace.VMEM)

    # VMEM budget sized from the actual operand set (+ rough intermediate /
    # headroom estimate); default scoped limits are only 16/32 MiB.
    args = (adj.astype(jnp.bfloat16), inv_deg, dinv, sdinv2,
            x.astype(jnp.bfloat16)) + tuple(packed)
    operand_bytes = sum(int(a.size) * a.dtype.itemsize for a in args)
    inter_bytes = 8 * n * max(h_dim, d2) * 4 + n * d2 * 4
    vmem_limit = int(min(max(2 * (operand_bytes + inter_bytes), 16 << 20),
                         60 << 20))

    return pl.pallas_call(
        _fused_encoder_kernel,
        out_shape=jax.ShapeDtypeStruct((n, d2), jnp.float32),
        in_specs=[vmem] * len(args),
        out_specs=vmem,
        compiler_params=pltpu.CompilerParams(vmem_limit_bytes=vmem_limit),
    )(*args)


# ------------------------- Graph operator building ------------------------- #

def build_adjacency_operators(edge_index, num_nodes):
    """One unnormalized adjacency + per-node normalization vectors.

    adj[i, j]  = #edges j -> i (target-major)
    inv_deg[i] = 1 / max(in_degree(i), 1)                 (PyG mean aggr)
    dinv[i]    = rsqrt(in_degree(i) + needs_self_loop(i)) (gcn_norm)
    sdinv2[i]  = needs_self_loop(i) * dinv[i]^2           (self-loop term)
    """
    row, col = edge_index[0], edge_index[1]
    adj = jnp.zeros((num_nodes, num_nodes), jnp.float32).at[col, row].add(1.0)
    in_deg = adj.sum(axis=1, keepdims=True)                        # (N, 1)
    inv_deg = 1.0 / jnp.maximum(in_deg, 1.0)
    diag = jnp.diagonal(adj)[:, None]
    s = jnp.where(diag > 0, 0.0, 1.0)                              # add_remaining_self_loops
    deg_gcn = in_deg + s
    dinv = jnp.where(deg_gcn > 0, jax.lax.rsqrt(deg_gcn), 0.0)
    sdinv2 = s * dinv * dinv
    return adj, inv_deg, dinv, sdinv2


# Dense normalized operators (reference path only).
def build_mean_adj(edge_index, num_nodes):
    row, col = edge_index[0], edge_index[1]
    adj = jnp.zeros((num_nodes, num_nodes), jnp.float32).at[col, row].add(1.0)
    in_deg = adj.sum(axis=1, keepdims=True)
    return adj / jnp.maximum(in_deg, 1.0)


def build_gcn_adj(edge_index, num_nodes):
    row, col = edge_index[0], edge_index[1]
    adj = jnp.zeros((num_nodes, num_nodes), jnp.float32).at[col, row].add(1.0)
    diag = jnp.diagonal(adj)
    adj = adj + jnp.diag(jnp.where(diag > 0, 0.0, 1.0))
    deg = adj.sum(axis=1)
    dinv = jnp.where(deg > 0, jax.lax.rsqrt(deg), 0.0)
    return dinv[:, None] * adj * dinv[None, :]


# ------------------------- Parameters + forward ----------------------------- #

def init_params(key, input_dim, hidden_dim):
    def glorot(k, shape):
        fan_in, fan_out = shape[1], shape[0]
        limit = (6.0 / (fan_in + fan_out)) ** 0.5
        return jax.random.uniform(k, shape, jnp.float32, -limit, limit)

    ks = jax.random.split(key, 9)
    return {
        # GraphSAGE layer 0: in -> hidden (PyTorch layout: [out, in])
        "sage0_wl": glorot(ks[0], (hidden_dim, input_dim)),
        "sage0_wr": glorot(ks[1], (hidden_dim, input_dim)),
        "sage0_b": jnp.zeros((hidden_dim,), jnp.float32),
        # GraphSAGE layer 1: hidden -> out(=hidden)
        "sage1_wl": glorot(ks[2], (hidden_dim, hidden_dim)),
        "sage1_wr": glorot(ks[3], (hidden_dim, hidden_dim)),
        "sage1_b": jnp.zeros((hidden_dim,), jnp.float32),
        # GCNConv heads: hidden -> input_dim
        "gcn_shared_w": glorot(ks[4], (input_dim, hidden_dim)),
        "gcn_shared_b": jnp.zeros((input_dim,), jnp.float32),
        "gcn_mu_w": glorot(ks[5], (input_dim, hidden_dim)),
        "gcn_mu_b": jnp.zeros((input_dim,), jnp.float32),
        "gcn_logvar_w": glorot(ks[6], (input_dim, hidden_dim)),
        "gcn_logvar_b": jnp.zeros((input_dim,), jnp.float32),
    }


def pack_params(p):
    """Pre-transpose PyTorch-layout weights, cast to bf16, keep biases f32."""
    bf = jnp.bfloat16
    return (
        p["sage0_wl"].T.astype(bf),                                   # (Din, H)
        p["sage0_wr"].T.astype(bf),                                   # (Din, H)
        p["sage0_b"].reshape(1, -1),                                  # f32 (1, H)
        p["sage1_wl"].T.astype(bf),                                   # (H, H)
        p["sage1_wr"].T.astype(bf),                                   # (H, H)
        p["sage1_b"].reshape(1, -1),
        p["gcn_shared_w"].T.astype(bf),                               # (H, Dout)
        p["gcn_shared_b"].reshape(1, -1),
        jnp.concatenate([p["gcn_mu_w"].T, p["gcn_logvar_w"].T],
                        axis=1).astype(bf),                           # (H, 2*Dout)
        jnp.concatenate([p["gcn_mu_b"], p["gcn_logvar_b"]]).reshape(1, -1),
    )


@jax.jit
def graphsage_encoder_forward(params, edge_emb_eq1, edge_index):
    n = edge_emb_eq1.shape[0]
    d_out = params["gcn_mu_w"].shape[0]
    adj, inv_deg, dinv, sdinv2 = build_adjacency_operators(edge_index, n)
    packed = pack_params(params)
    out = fused_encoder(adj, inv_deg, dinv, sdinv2, edge_emb_eq1, packed)
    mu, logvar = out[:, :d_out], out[:, d_out:]
    return mu, logvar


# ------------------------- Pure-JAX reference ------------------------------- #

def _reference_forward(params, x, edge_index):
    dot = functools.partial(jnp.dot, precision=jax.lax.Precision.HIGHEST)
    n = x.shape[0]
    a_mean = build_mean_adj(edge_index, n)
    a_gcn = build_gcn_adj(edge_index, n)
    h = (dot(dot(a_mean, x), params["sage0_wl"].T)
         + dot(x, params["sage0_wr"].T) + params["sage0_b"])
    h = jnp.maximum(h, 0.0)
    h = (dot(dot(a_mean, h), params["sage1_wl"].T)
         + dot(h, params["sage1_wr"].T) + params["sage1_b"])
    xg = jnp.maximum(
        dot(a_gcn, dot(h, params["gcn_shared_w"].T)) + params["gcn_shared_b"], 0.0)
    mu = dot(a_gcn, dot(xg, params["gcn_mu_w"].T)) + params["gcn_mu_b"]
    lv = dot(a_gcn, dot(xg, params["gcn_logvar_w"].T)) + params["gcn_logvar_b"]
    return mu, lv


# ---------------------------------- Main ------------------------------------ #

if __name__ == "__main__":
    key = jax.random.PRNGKey(0)
    k_x, k_e, k_p = jax.random.split(key, 3)

    N_NODES = 128     # number of graph nodes
    INPUT_DIM = 128   # stand-in for 768 (small, shape-consistent)
    HIDDEN_DIM = 128
    N_EDGES = 512

    edge_emb_eq1 = jax.random.normal(k_x, (N_NODES, INPUT_DIM), jnp.float32)
    edge_index = jax.random.randint(k_e, (2, N_EDGES), 0, N_NODES, jnp.int32)

    params = init_params(k_p, INPUT_DIM, HIDDEN_DIM)

    mu, logvar = graphsage_encoder_forward(params, edge_emb_eq1, edge_index)
    jax.block_until_ready((mu, logvar))

    assert mu.shape == (N_NODES, INPUT_DIM)
    assert logvar.shape == (N_NODES, INPUT_DIM)
    assert jnp.all(jnp.isfinite(mu)) and jnp.all(jnp.isfinite(logvar))

    # Loose check against a pure-JAX f32 HIGHEST-precision reference.  The
    # kernel uses bf16 MXU operands with f32 accumulation (adjacency counts
    # are exact in bf16; only activations lose mantissa), so allow a few
    # percent relative slack.
    mu_ref, lv_ref = _reference_forward(params, edge_emb_eq1, edge_index)
    scale = 1.0 + float(jnp.maximum(jnp.max(jnp.abs(mu_ref)),
                                    jnp.max(jnp.abs(lv_ref))))
    assert float(jnp.max(jnp.abs(mu - mu_ref))) < 5e-2 * scale
    assert float(jnp.max(jnp.abs(logvar - lv_ref))) < 5e-2 * scale

    print("KERNEL_OK")
</pallas_src>

<mosaic_0001>
module attributes {stable_mosaic.version = 11 : i64} {
  func.func @_fused_encoder_kernel(%arg0: memref<128x128xbf16, #tpu.memory_space<vmem>>, %arg1: memref<128x1xf32, #tpu.memory_space<vmem>>, %arg2: memref<128x1xf32, #tpu.memory_space<vmem>>, %arg3: memref<128x1xf32, #tpu.memory_space<vmem>>, %arg4: memref<128x128xbf16, #tpu.memory_space<vmem>>, %arg5: memref<128x128xbf16, #tpu.memory_space<vmem>>, %arg6: memref<128x128xbf16, #tpu.memory_space<vmem>>, %arg7: memref<1x128xf32, #tpu.memory_space<vmem>>, %arg8: memref<128x128xbf16, #tpu.memory_space<vmem>>, %arg9: memref<128x128xbf16, #tpu.memory_space<vmem>>, %arg10: memref<1x128xf32, #tpu.memory_space<vmem>>, %arg11: memref<128x128xbf16, #tpu.memory_space<vmem>>, %arg12: memref<1x128xf32, #tpu.memory_space<vmem>>, %arg13: memref<128x256xbf16, #tpu.memory_space<vmem>>, %arg14: memref<1x256xf32, #tpu.memory_space<vmem>>, %arg15: memref<128x256xf32, #tpu.memory_space<vmem>>) attributes {dimension_semantics = [], scalar_prefetch = 0 : i64, scratch_operands = 0 : i64, tpu.core_type = #tpu.core_type<tc>} {
    %c0 = arith.constant 0 : index
    %c0_0 = arith.constant 0 : index
    %0 = vector.load %arg0[%c0, %c0_0] : memref<128x128xbf16, #tpu.memory_space<vmem>>, vector<128x128xbf16>
    %c0_1 = arith.constant 0 : index
    %c0_2 = arith.constant 0 : index
    %1 = vector.load %arg1[%c0_1, %c0_2] : memref<128x1xf32, #tpu.memory_space<vmem>>, vector<128x1xf32>
    %c0_3 = arith.constant 0 : index
    %c0_4 = arith.constant 0 : index
    %2 = vector.load %arg2[%c0_3, %c0_4] : memref<128x1xf32, #tpu.memory_space<vmem>>, vector<128x1xf32>
    %c0_5 = arith.constant 0 : index
    %c0_6 = arith.constant 0 : index
    %3 = vector.load %arg3[%c0_5, %c0_6] : memref<128x1xf32, #tpu.memory_space<vmem>>, vector<128x1xf32>
    %c0_7 = arith.constant 0 : index
    %c0_8 = arith.constant 0 : index
    %4 = vector.load %arg4[%c0_7, %c0_8] : memref<128x128xbf16, #tpu.memory_space<vmem>>, vector<128x128xbf16>
    %c0_9 = arith.constant 0 : index
    %c0_10 = arith.constant 0 : index
    %5 = vector.load %arg5[%c0_9, %c0_10] : memref<128x128xbf16, #tpu.memory_space<vmem>>, vector<128x128xbf16>
    %cst = arith.constant dense<0.000000e+00> : vector<128x128xf32>
    %6 = tpu.matmul %4, %5, %cst {dimension_numbers = #tpu.dot_dimension_numbers<[1], [0], [0], [1], [0, 0, 1, 1], [], []>} : vector<128x128xbf16>, vector<128x128xbf16>, vector<128x128xf32> -> vector<128x128xf32>
    %c0_11 = arith.constant 0 : index
    %c0_12 = arith.constant 0 : index
    %7 = vector.load %arg6[%c0_11, %c0_12] : memref<128x128xbf16, #tpu.memory_space<vmem>>, vector<128x128xbf16>
    %cst_13 = arith.constant dense<0.000000e+00> : vector<128x128xf32>
    %8 = tpu.matmul %4, %7, %cst_13 {dimension_numbers = #tpu.dot_dimension_numbers<[1], [0], [0], [1], [0, 0, 1, 1], [], []>} : vector<128x128xbf16>, vector<128x128xbf16>, vector<128x128xf32> -> vector<128x128xf32>
    %9 = arith.truncf %6 : vector<128x128xf32> to vector<128x128xbf16>
    %cst_14 = arith.constant dense<0.000000e+00> : vector<128x128xf32>
    %10 = tpu.matmul %0, %9, %cst_14 {dimension_numbers = #tpu.dot_dimension_numbers<[1], [0], [0], [1], [0, 0, 1, 1], [], []>} : vector<128x128xbf16>, vector<128x128xbf16>, vector<128x128xf32> -> vector<128x128xf32>
    %11 = vector.broadcast %1 : vector<128x1xf32> to vector<128x128xf32>
    %12 = arith.mulf %11, %10 : vector<128x128xf32>
    %13 = arith.addf %12, %8 : vector<128x128xf32>
    %c0_15 = arith.constant 0 : index
    %c0_16 = arith.constant 0 : index
    %14 = vector.load %arg7[%c0_15, %c0_16] : memref<1x128xf32, #tpu.memory_space<vmem>>, vector<1x128xf32>
    %15 = vector.broadcast %14 : vector<1x128xf32> to vector<128x128xf32>
    %16 = arith.addf %13, %15 : vector<128x128xf32>
    %cst_17 = arith.constant 0.000000e+00 : f32
    %17 = vector.broadcast %cst_17 : f32 to vector<128x128xf32>
    %18 = arith.maximumf %16, %17 : vector<128x128xf32>
    %19 = arith.truncf %18 : vector<128x128xf32> to vector<128x128xbf16>
    %c0_18 = arith.constant 0 : index
    %c0_19 = arith.constant 0 : index
    %20 = vector.load %arg8[%c0_18, %c0_19] : memref<128x128xbf16, #tpu.memory_space<vmem>>, vector<128x128xbf16>
    %cst_20 = arith.constant dense<0.000000e+00> : vector<128x128xf32>
    %21 = tpu.matmul %19, %20, %cst_20 {dimension_numbers = #tpu.dot_dimension_numbers<[1], [0], [0], [1], [0, 0, 1, 1], [], []>} : vector<128x128xbf16>, vector<128x128xbf16>, vector<128x128xf32> -> vector<128x128xf32>
    %c0_21 = arith.constant 0 : index
    %c0_22 = arith.constant 0 : index
    %22 = vector.load %arg9[%c0_21, %c0_22] : memref<128x128xbf16, #tpu.memory_space<vmem>>, vector<128x128xbf16>
    %cst_23 = arith.constant dense<0.000000e+00> : vector<128x128xf32>
    %23 = tpu.matmul %19, %22, %cst_23 {dimension_numbers = #tpu.dot_dimension_numbers<[1], [0], [0], [1], [0, 0, 1, 1], [], []>} : vector<128x128xbf16>, vector<128x128xbf16>, vector<128x128xf32> -> vector<128x128xf32>
    %24 = arith.truncf %21 : vector<128x128xf32> to vector<128x128xbf16>
    %cst_24 = arith.constant dense<0.000000e+00> : vector<128x128xf32>
    %25 = tpu.matmul %0, %24, %cst_24 {dimension_numbers = #tpu.dot_dimension_numbers<[1], [0], [0], [1], [0, 0, 1, 1], [], []>} : vector<128x128xbf16>, vector<128x128xbf16>, vector<128x128xf32> -> vector<128x128xf32>
    %26 = vector.broadcast %1 : vector<128x1xf32> to vector<128x128xf32>
    %27 = arith.mulf %26, %25 : vector<128x128xf32>
    %28 = arith.addf %27, %23 : vector<128x128xf32>
    %c0_25 = arith.constant 0 : index
    %c0_26 = arith.constant 0 : index
    %29 = vector.load %arg10[%c0_25, %c0_26] : memref<1x128xf32, #tpu.memory_space<vmem>>, vector<1x128xf32>
    %30 = vector.broadcast %29 : vector<1x128xf32> to vector<128x128xf32>
    %31 = arith.addf %28, %30 : vector<128x128xf32>
    %32 = arith.truncf %31 : vector<128x128xf32> to vector<128x128xbf16>
    %c0_27 = arith.constant 0 : index
    %c0_28 = arith.constant 0 : index
    %33 = vector.load %arg11[%c0_27, %c0_28] : memref<128x128xbf16, #tpu.memory_space<vmem>>, vector<128x128xbf16>
    %cst_29 = arith.constant dense<0.000000e+00> : vector<128x128xf32>
    %34 = tpu.matmul %32, %33, %cst_29 {dimension_numbers = #tpu.dot_dimension_numbers<[1], [0], [0], [1], [0, 0, 1, 1], [], []>} : vector<128x128xbf16>, vector<128x128xbf16>, vector<128x128xf32> -> vector<128x128xf32>
    %35 = vector.broadcast %2 : vector<128x1xf32> to vector<128x128xf32>
    %36 = arith.mulf %35, %34 : vector<128x128xf32>
    %37 = arith.truncf %36 : vector<128x128xf32> to vector<128x128xbf16>
    %cst_30 = arith.constant dense<0.000000e+00> : vector<128x128xf32>
    %38 = tpu.matmul %0, %37, %cst_30 {dimension_numbers = #tpu.dot_dimension_numbers<[1], [0], [0], [1], [0, 0, 1, 1], [], []>} : vector<128x128xbf16>, vector<128x128xbf16>, vector<128x128xf32> -> vector<128x128xf32>
    %39 = vector.broadcast %2 : vector<128x1xf32> to vector<128x128xf32>
    %40 = arith.mulf %39, %38 : vector<128x128xf32>
    %41 = vector.broadcast %3 : vector<128x1xf32> to vector<128x128xf32>
    %42 = arith.mulf %41, %34 : vector<128x128xf32>
    %43 = arith.addf %40, %42 : vector<128x128xf32>
    %c0_31 = arith.constant 0 : index
    %c0_32 = arith.constant 0 : index
    %44 = vector.load %arg12[%c0_31, %c0_32] : memref<1x128xf32, #tpu.memory_space<vmem>>, vector<1x128xf32>
    %45 = vector.broadcast %44 : vector<1x128xf32> to vector<128x128xf32>
    %46 = arith.addf %43, %45 : vector<128x128xf32>
    %cst_33 = arith.constant 0.000000e+00 : f32
    %47 = vector.broadcast %cst_33 : f32 to vector<128x128xf32>
    %48 = arith.maximumf %46, %47 : vector<128x128xf32>
    %49 = arith.truncf %48 : vector<128x128xf32> to vector<128x128xbf16>
    %c0_34 = arith.constant 0 : index
    %c0_35 = arith.constant 0 : index
    %50 = vector.load %arg13[%c0_34, %c0_35] : memref<128x256xbf16, #tpu.memory_space<vmem>>, vector<128x256xbf16>
    %cst_36 = arith.constant dense<0.000000e+00> : vector<128x256xf32>
    %51 = tpu.matmul %49, %50, %cst_36 {dimension_numbers = #tpu.dot_dimension_numbers<[1], [0], [0], [1], [0, 0, 1, 1], [], []>} : vector<128x128xbf16>, vector<128x256xbf16>, vector<128x256xf32> -> vector<128x256xf32>
    %52 = vector.broadcast %2 : vector<128x1xf32> to vector<128x256xf32>
    %53 = arith.mulf %52, %51 : vector<128x256xf32>
    %54 = arith.truncf %53 : vector<128x256xf32> to vector<128x256xbf16>
    %cst_37 = arith.constant dense<0.000000e+00> : vector<128x256xf32>
    %55 = tpu.matmul %0, %54, %cst_37 {dimension_numbers = #tpu.dot_dimension_numbers<[1], [0], [0], [1], [0, 0, 1, 1], [], []>} : vector<128x128xbf16>, vector<128x256xbf16>, vector<128x256xf32> -> vector<128x256xf32>
    %56 = vector.broadcast %2 : vector<128x1xf32> to vector<128x256xf32>
    %57 = arith.mulf %56, %55 : vector<128x256xf32>
    %58 = vector.broadcast %3 : vector<128x1xf32> to vector<128x256xf32>
    %59 = arith.mulf %58, %51 : vector<128x256xf32>
    %60 = arith.addf %57, %59 : vector<128x256xf32>
    %c0_38 = arith.constant 0 : index
    %c0_39 = arith.constant 0 : index
    %61 = vector.load %arg14[%c0_38, %c0_39] : memref<1x256xf32, #tpu.memory_space<vmem>>, vector<1x256xf32>
    %62 = vector.broadcast %61 : vector<1x256xf32> to vector<128x256xf32>
    %63 = arith.addf %60, %62 : vector<128x256xf32>
    %c0_40 = arith.constant 0 : index
    %c0_41 = arith.constant 0 : index
    %64 = vector.load %arg15[%c0_40, %c0_41] : memref<128x256xf32, #tpu.memory_space<vmem>>, vector<128x256xf32>
    tpu.vector_store %arg15[%c0_40, %c0_41], %63 {strides = array<i32>} : memref<128x256xf32, #tpu.memory_space<vmem>>, vector<128x256xf32>,
    return
  }
}

</mosaic_0001>

<bundles_post_ra>
// kernel: graphsage_encoder_forward.1
= control target key start
LH: loop header
LB: loop body
LE: loop exit
PB: predicated region body
PF: predicated region fallthrough
CT: control target
= control target key end

     0   :  { %v2331_v20 = vmov 0   ;;  %s3659_s5 = inlined_call_operand.vmem [shape: bf16[128,128], index: 5, kind: input, shape index: {}]   ;;  %s3660_s4 = inlined_call_operand.vmem [shape: bf16[128,128], index: 4, kind: input, shape index: {}]   ;;  %s3661_s1 = inlined_call_operand.vmem [shape: f32[128,1], index: 1, kind: input, shape index: {}]   ;;  %s3662_s2 = inlined_call_operand.vmem [shape: f32[128,1], index: 2, kind: input, shape index: {}]   ;;  %s3663_s6 = inlined_call_operand.vmem [shape: bf16[128,128], index: 6, kind: input, shape index: {}]   ;;  %s3664_s3 = inlined_call_operand.vmem [shape: f32[128,1], index: 3, kind: input, shape index: {}]   ;;  %s3665_s0 = inlined_call_operand.vmem [shape: bf16[128,128], index: 0, kind: input, shape index: {}]   ;;  %s3666_s7 = inlined_call_operand.vmem [shape: f32[1,128], index: 7, kind: input, shape index: {}]   ;;  %s3667_s8 = inlined_call_operand.vmem [shape: bf16[128,128], index: 8, kind: input, shape index: {}]   ;;  %s3668_s9 = inlined_call_operand.vmem [shape: bf16[128,128], index: 9, kind: input, shape index: {}]   ;;  %s3669_s10 = inlined_call_operand.vmem [shape: f32[1,128], index: 10, kind: input, shape index: {}]   ;;  %s3670_s11 = inlined_call_operand.vmem [shape: bf16[128,128], index: 11, kind: input, shape index: {}]   ;;  %s3671_s12 = inlined_call_operand.vmem [shape: f32[1,128], index: 12, kind: input, shape index: {}]   ;;  %s3672_s13 = inlined_call_operand.vmem [shape: bf16[128,256], index: 13, kind: input, shape index: {}]   ;;  %s3673_s14 = inlined_call_operand.vmem [shape: f32[1,256], index: 14, kind: input, shape index: {}]   ;;  %s3674_s15 = inlined_call_operand.vmem [shape: f32[128,256], index: 15, kind: output, shape index: {}]  }
   0x1   :  { %v2267_v0 = vld [vmem:[%s3659_s5 + $0x38] sm:$0xff]  ;;  %v2266_v1 = vld [vmem:[%s3659_s5 + $0x30] sm:$0xff]  ;;  %v2265_v2 = vld [vmem:[%s3659_s5 + $0x28] sm:$0xff]  ;;  %2317 = vset.pattern.permute.xlu0 %v2331_v20  ;;  %2318 = vset.pattern.permute.xlu1 %v2331_v20 }
   0x2   :  { %242 = vmatpush.bf16.msra.mxu0 %v2267_v0  ;;  %v2264_v3 = vld [vmem:[%s3659_s5 + $0x20] sm:$0xff]  ;;  %v2263_v4 = vld [vmem:[%s3659_s5 + $0x18] sm:$0xff]  ;;  %v2262_v5 = vld [vmem:[%s3659_s5 + $0x10] sm:$0xff]  ;;  %2319 = vset.pattern.permute.xlu2 %v2331_v20 }
   0x3   :  { %v2261_v6 = vld [vmem:[%s3659_s5 + $0x8] sm:$0xff]  ;;  %v2260_v7 = vld [vmem:[%s3659_s5] sm:$0xff]  ;;  %v2451_v10 = vld [vmem:[%s3660_s4 + $0x10] sm:$0xff] }
   0x4   :  { %v2439_v8 = vld [vmem:[%s3660_s4] sm:$0xff]  ;;  %v2445_v9 = vld [vmem:[%s3660_s4 + $0x8] sm:$0xff]  ;;  %v2457_v11 = vld [vmem:[%s3660_s4 + $0x18] sm:$0xff] }
   0x5   :  { %v2463_v12 = vld [vmem:[%s3660_s4 + $0x20] sm:$0xff]  ;;  %v2469_v13 = vld [vmem:[%s3660_s4 + $0x28] sm:$0xff]  ;;  %v2475_v14 = vld [vmem:[%s3660_s4 + $0x30] sm:$0xff] }
   0x6   :  { %243 = vmatpush.bf16.msra.mxu0 %v2266_v1  ;;  %v2481_v15 = vld [vmem:[%s3660_s4 + $0x38] sm:$0xff]  ;;  %v66_v19 = vld [vmem:[%s3661_s1] sm:$0xff]  ;;  %v67_v22 = vld [vmem:[%s3661_s1 + $0x8] sm:$0xff] }
   0x7   :  { %511 = vperm.xlu0 %2317, %v66_v19   ;;  %v68_v24 = vld [vmem:[%s3661_s1 + $0x10] sm:$0xff]  ;;  %v69_v27 = vld [vmem:[%s3661_s1 + $0x18] sm:$0xff]  ;;  %v75_v28 = vld [vmem:[%s3661_s1 + $0x48] sm:$0xff] }
   0x8   :  { %v72_v25 = vld [vmem:[%s3661_s1 + $0x30] sm:$0xff]  ;;  %521 = vperm.xlu1 %2318, %v68_v24   ;;  %v73_v30 = vld [vmem:[%s3661_s1 + $0x38] sm:$0xff]  ;;  %v78_v31 = vld [vmem:[%s3661_s1 + $0x60] sm:$0xff] }
   0x9   :  { %v76_v33 = vld [vmem:[%s3661_s1 + $0x50] sm:$0xff]  ;;  %v81_v34 = vld [vmem:[%s3661_s1 + $0x78] sm:$0xff]  ;;  %v79_v36 = vld [vmem:[%s3661_s1 + $0x68] sm:$0xff] }
   0xa   :  { %244 = vmatpush.bf16.msra.mxu0 %v2265_v2  ;;  %v94_v37 = vld [vmem:[%s3662_s2 + $0x60] sm:$0xff]  ;;  %v96_v40 = vld [vmem:[%s3662_s2 + $0x70] sm:$0xff]  ;;  %v93_v41 = vld [vmem:[%s3662_s2 + $0x58] sm:$0xff] }
   0xb   :  { %v70_v39 = vld [vmem:[%s3661_s1 + $0x20] sm:$0xff]  ;;  %v71_v43 = vld [vmem:[%s3661_s1 + $0x28] sm:$0xff]  ;;  %v88_v45 = vld [vmem:[%s3662_s2 + $0x30] sm:$0xff] }
   0xc   :  { %531 = vperm.xlu2 %2319, %v70_v39   ;;  %v95_v44 = vld [vmem:[%s3662_s2 + $0x68] sm:$0xff]  ;;  %v2275_v47 = vld [vmem:[%s3663_s6 + $0x38] sm:$0xff]  ;;  %v74_v48 = vld [vmem:[%s3661_s1 + $0x40] sm:$0xff] }
   0xd   :  { %355 = vmatpush.bf16.msra.mxu1 %v2275_v47  ;;  %v90_v49 = vld [vmem:[%s3662_s2 + $0x40] sm:$0xff]  ;;  %v87_v50 = vld [vmem:[%s3662_s2 + $0x28] sm:$0xff]  ;;  %v2274_v51 = vld [vmem:[%s3663_s6 + $0x30] sm:$0xff] }
   0xe   :  { %245 = vmatpush.bf16.msra.mxu0 %v2264_v3  ;;  %v2273_v52 = vld [vmem:[%s3663_s6 + $0x28] sm:$0xff]  ;;  %v77_v54 = vld [vmem:[%s3661_s1 + $0x58] sm:$0xff]  ;;  %v82_v56 = vld [vmem:[%s3662_s2] sm:$0xff] }
   0xf   :  { %516 = vperm.xlu0 %2317, %v67_v22   ;;  %v89_v55 = vld [vmem:[%s3662_s2 + $0x38] sm:$0xff]  ;;  %v2272_v57 = vld [vmem:[%s3663_s6 + $0x20] sm:$0xff]  ;;  %v80_v60 = vld [vmem:[%s3661_s1 + $0x70] sm:$0xff] }
  0x10   :  { %526 = vperm.xlu1 %2318, %v69_v27   ;;  %v2271_v58 = vld [vmem:[%s3663_s6 + $0x18] sm:$0xff]  ;;  %v84_v61 = vld [vmem:[%s3662_s2 + $0x10] sm:$0xff]  ;;  %v99_v62 = vld [vmem:[%s3664_s3 + $0x8] sm:$0xff] }
  0x11   :  { %356 = vmatpush.bf16.msra.mxu1 %v2274_v51  ;;  %v2270_v63 = vld [vmem:[%s3663_s6 + $0x10] sm:$0xff]  ;;  %v2269_v0 = vld [vmem:[%s3663_s6 + $0x8] sm:$0xff]  ;;  %v97_v2 = vld [vmem:[%s3662_s2 + $0x78] sm:$0xff] }
  0x12   :  { %246 = vmatpush.bf16.msra.mxu0 %v2263_v4  ;;  %v83_v3 = vld [vmem:[%s3662_s2 + $0x8] sm:$0xff]  ;;  %v102_v4 = vld [vmem:[%s3664_s3 + $0x20] sm:$0xff]  ;;  %v92_v19 = vld [vmem:[%s3662_s2 + $0x50] sm:$0xff] }
  0x13   :  { %v100_v20 = vld [vmem:[%s3664_s3 + $0x10] sm:$0xff]  ;;  %v105_v22 = vld [vmem:[%s3664_s3 + $0x38] sm:$0xff]  ;;  %v103_v27 = vld [vmem:[%s3664_s3 + $0x28] sm:$0xff] }
  0x14   :  { %536 = vperm.xlu2 %2319, %v71_v43   ;;  %v113_v39 = vld [vmem:[%s3664_s3 + $0x78] sm:$0xff]  ;;  %v2281_v43 = vld [vmem:[%s3667_s8 + $0x28] sm:$0xff]  ;;  %v2756_v47 = vld [vmem:[%s3665_s0 + $0x30] sm:$0xff] }
  0x15   :  { %357 = vmatpush.bf16.msra.mxu1 %v2273_v52  ;;  %v2278_v51 = vld [vmem:[%s3667_s8 + $0x10] sm:$0xff] }
  0x16   :  { %247 = vmatpush.bf16.msra.mxu0 %v2262_v5  ;;  %v2268_v5 = vld [vmem:[%s3663_s6] sm:$0xff]  ;;  %v2286_v52 = vld [vmem:[%s3668_s9 + $0x10] sm:$0xff] }
  0x17   :  { %541 = vperm.xlu0 %2317, %v72_v25  }
  0x18   :  { %546 = vperm.xlu1 %2318, %v73_v30  }
  0x19   :  { %358 = vmatpush.bf16.msra.mxu1 %v2272_v57  ;;  %v2284_v57 = vld [vmem:[%s3668_s9] sm:$0xff] }
  0x1a   :  { %248 = vmatpush.bf16.msra.mxu0 %v2261_v6 }
  0x1c   :  { %551 = vperm.xlu2 %2319, %v74_v48   ;;  %v2279_v48 = vld [vmem:[%s3667_s8 + $0x18] sm:$0xff] }
  0x1d   :  { %359 = vmatpush.bf16.msra.mxu1 %v2271_v58 }
  0x1e   :  { %249 = vmatpush.bf16.msra.mxu0 %v2260_v7 }
  0x1f   :  { %556 = vperm.xlu0 %2317, %v75_v28   ;;  %v108_v28 = vld [vmem:[%s3664_s3 + $0x50] sm:$0xff] }
  0x20   :  { %561 = vperm.xlu1 %2318, %v76_v33   ;;  %v86_v33 = vld [vmem:[%s3662_s2 + $0x20] sm:$0xff] }
  0x21   :  { %250 = vmatmul.bf16.vlgmr.msra.gmra.mxu0 %v2439_v8  ;;  %360 = vmatpush.bf16.msra.mxu1 %v2270_v63 }
  0x24   :  { %566 = vperm.xlu2 %2319, %v77_v54   ;;  %v2277_v54 = vld [vmem:[%s3667_s8 + $0x8] sm:$0xff] }
  0x25   :  { %361 = vmatpush.bf16.msra.mxu1 %v2269_v0 }
  0x27   :  { %571 = vperm.xlu0 %2317, %v78_v31  }
  0x28   :  { %576 = vperm.xlu1 %2318, %v79_v36   ;;  %v111_v36 = vld [vmem:[%s3664_s3 + $0x68] sm:$0xff] }
  0x29   :  { %362 = vmatpush.bf16.msra.mxu1 %v2268_v5 }
  0x2c   :  { %581 = vperm.xlu2 %2319, %v80_v60   ;;  %363 = vmatmul.bf16.vlgmr.msra.gmra.mxu1 %v2439_v8  ;;  %v91_v8 = vld [vmem:[%s3662_s2 + $0x48] sm:$0xff] }
  0x2f   :  { %586 = vperm.xlu0 %2317, %v81_v34   ;;  %v106_v34 = vld [vmem:[%s3664_s3 + $0x40] sm:$0xff] }
  0x30   :  { %1193 = vperm.xlu1 %2318, %v96_v40   ;;  %v2711_v40 = vld [vmem:[%s3665_s0 + $0x18] sm:$0xff] }
  0x31   :  { %255 = vmatmul.bf16.gmra.mxu0 %v2445_v9 }
  0x34   :  { %1198 = vperm.xlu2 %2319, %v97_v2  }
  0x37   :  { %1183 = vperm.xlu0 %2317, %v94_v37  }
  0x38   :  { %1188 = vperm.xlu1 %2318, %v95_v44   ;;  %v2289_v44 = vld [vmem:[%s3668_s9 + $0x28] sm:$0xff] }
  0x3c   :  { %1173 = vperm.xlu2 %2319, %v92_v19   ;;  %368 = vmatmul.bf16.gmra.mxu1 %v2445_v9  ;;  %v85_v9 = vld [vmem:[%s3662_s2 + $0x18] sm:$0xff] }
  0x3f   :  { %1178 = vperm.xlu0 %2317, %v93_v41   ;;  %v2725_v41 = vld [vmem:[%s3665_s0 + $0x28] sm:$0xff] }
  0x40   :  { %1163 = vperm.xlu1 %2318, %v90_v49   ;;  %v2287_v49 = vld [vmem:[%s3668_s9 + $0x18] sm:$0xff] }
  0x41   :  { %260 = vmatmul.bf16.gmra.mxu0 %v2451_v10 }
  0x44   :  { %1168 = vperm.xlu2 %2319, %v91_v8  }
  0x47   :  { %1153 = vperm.xlu0 %2317, %v88_v45   ;;  %v2280_v45 = vld [vmem:[%s3667_s8 + $0x20] sm:$0xff] }
  0x48   :  { %1158 = vperm.xlu1 %2318, %v89_v55   ;;  %v2285_v55 = vld [vmem:[%s3668_s9 + $0x8] sm:$0xff] }
  0x4c   :  { %1143 = vperm.xlu2 %2319, %v86_v33   ;;  %373 = vmatmul.bf16.gmra.mxu1 %v2451_v10  ;;  %v2685_v10 = vld [vmem:[%s3665_s0 + $0x8] sm:$0xff] }
  0x4f   :  { %1148 = vperm.xlu0 %2317, %v87_v50  }
  0x50   :  { %1133 = vperm.xlu1 %2318, %v84_v61  }
  0x51   :  { %265 = vmatmul.bf16.gmra.mxu0 %v2457_v11 }
  0x54   :  { %1138 = vperm.xlu2 %2319, %v85_v9  }
  0x57   :  { %1123 = vperm.xlu0 %2317, %v82_v56   ;;  %v2276_v56 = vld [vmem:[%s3667_s8] sm:$0xff] }
  0x58   :  { %1128 = vperm.xlu1 %2318, %v83_v3  }
  0x5c   :  { %378 = vmatmul.bf16.gmra.mxu1 %v2457_v11  ;;  %v110_v11 = vld [vmem:[%s3664_s3 + $0x60] sm:$0xff] }
  0x5f   :  { %1297 = vperm.xlu0 %2317, %v99_v62  }
  0x60   :  { %1302 = vperm.xlu1 %2318, %v100_v20  }
  0x61   :  { %270 = vmatmul.bf16.gmra.mxu0 %v2463_v12 }
  0x67   :  { %1312 = vperm.xlu0 %2317, %v102_v4  }
  0x68   :  { %1317 = vperm.xlu1 %2318, %v103_v27  }
  0x6c   :  { %383 = vmatmul.bf16.gmra.mxu1 %v2463_v12  ;;  %v2718_v12 = vld [vmem:[%s3665_s0 + $0x20] sm:$0xff] }
  0x6f   :  { %1327 = vperm.xlu0 %2317, %v105_v22  }
  0x70   :  { %1332 = vperm.xlu1 %2318, %v106_v34  }
  0x71   :  { %275 = vmatmul.bf16.gmra.mxu0 %v2469_v13 }
  0x77   :  { %1342 = vperm.xlu0 %2317, %v108_v28  }
  0x79   :  { %v2789_v60 = vpop.permute.xlu0 %511 }
  0x7a   :  { %v2802_v20 = vpop.permute.xlu1 %521 }
  0x7c   :  { %388 = vmatmul.bf16.gmra.mxu1 %v2469_v13  ;;  %v2283_v13 = vld [vmem:[%s3667_s8 + $0x38] sm:$0xff] }
  0x7d   :  { %729 = vmatpush.bf16.msra.mxu3 %v2283_v13 }
  0x7f   :  { %1357 = vperm.xlu0 %2317, %v111_v36  }
  0x81   :  { %280 = vmatmul.bf16.gmra.mxu0 %v2475_v14  ;;  %v2797_v2 = vpop.permute.xlu0 %516 }
  0x8c   :  { %393 = vmatmul.bf16.gmra.mxu1 %v2475_v14  ;;  %v2282_v14 = vld [vmem:[%s3667_s8 + $0x30] sm:$0xff] }
  0x8d   :  { %730 = vmatpush.bf16.msra.mxu3 %v2282_v14 }
  0x91   :  { %285 = vmatmul.bf16.gmra.mxu0 %v2481_v15  ;;  %731 = vmatpush.bf16.msra.mxu3 %v2281_v43 }
  0x95   :  { %732 = vmatpush.bf16.msra.mxu3 %v2280_v45 }
  0x99   :  { %733 = vmatpush.bf16.msra.mxu3 %v2279_v48 }
  0x9c   :  { %398 = vmatmul.bf16.gmra.mxu1 %v2481_v15  ;;  %v2290_v15 = vld [vmem:[%s3668_s9 + $0x30] sm:$0xff] }
  0x9d   :  { %734 = vmatpush.bf16.msra.mxu3 %v2278_v51 }
  0x9e   :  { %v2484_v16 = vpop.f32.mrf.mxu0 }
  0xa1   :  { %735 = vmatpush.bf16.msra.mxu3 %v2277_v54 }
  0xa5   :  { %736 = vmatpush.bf16.msra.mxu3 %v2276_v56 }
  0xa6   :  { %v2486_v17 = vpop.f32.mrf.mxu0 }
  0xa7   :  { %v404_v37 = vpack.c.bf16 %v2486_v17, %v2484_v16  ;;  %v101_v16 = vld [vmem:[%s3664_s3 + $0x18] sm:$0xff]  ;;  %v104_v17 = vld [vmem:[%s3664_s3 + $0x30] sm:$0xff] }
  0xa9   :  { %v364_v50 = vpop.f32.mrf.mxu1 }
  0xae   :  { %v2488_v18 = vpop.f32.mrf.mxu0 }
  0xb1   :  { %v366_v58 = vpop.f32.mrf.mxu1 }
  0xb6   :  { %v2493_v21 = vpop.f32.mrf.mxu0 }
  0xbe   :  { %v2498_v23 = vpop.f32.mrf.mxu0 }
  0xc6   :  { %v2506_v26 = vpop.f32.mrf.mxu0 }
  0xce   :  { %v2514_v29 = vpop.f32.mrf.mxu0 }
  0xd6   :  { %v2522_v32 = vpop.f32.mrf.mxu0 }
  0xd7   :  { %v407_v31 = vpack.c.bf16 %v2522_v32, %v2514_v29  ;;  %v406_v29 = vpack.c.bf16 %v2506_v26, %v2498_v23  ;;  %v405_v32 = vpack.c.bf16 %v2493_v21, %v2488_v18  ;;  %v2669_v23 = vld [vmem:[%s3665_s0] sm:$0xff]  ;;  %v112_v21 = vld [vmem:[%s3664_s3 + $0x70] sm:$0xff]  ;;  %v107_v26 = vld [vmem:[%s3664_s3 + $0x48] sm:$0xff] }
  0xd8   :  { %v98_v18 = vld [vmem:[%s3664_s3] sm:$0xff] }
  0xd9   :  { %1292 = vperm.xlu2 %2319, %v98_v18  }
  0xde   :  { %v2530_v35 = vpop.f32.mrf.mxu0 }
  0xe1   :  { %1307 = vperm.xlu2 %2319, %v101_v16  }
  0xe6   :  { %v2538_v38 = vpop.f32.mrf.mxu0 }
  0xe7   :  { %v408_v30 = vpack.c.bf16 %v2538_v38, %v2530_v35  ;;  %v109_v35 = vld [vmem:[%s3664_s3 + $0x58] sm:$0xff]  ;;  %v2698_v38 = vld [vmem:[%s3665_s0 + $0x10] sm:$0xff] }
  0xe8   :  { %1347 = vperm.xlu1 %2318, %v109_v35  }
  0xe9   :  { %1322 = vperm.xlu2 %2319, %v104_v17  }
  0xee   :  { %v2549_v42 = vpop.f32.mrf.mxu0 }
  0xf0   :  { %1362 = vperm.xlu1 %2318, %v112_v21  }
  0xf1   :  { %1337 = vperm.xlu2 %2319, %v107_v26  }
  0xf6   :  { %v278_v46 = vpop.f32.mrf.mxu0 }
  0xf7   :  { %v409_v25 = vpack.c.bf16 %v278_v46, %v2549_v42  ;;  %v2291_v42 = vld [vmem:[%s3668_s9 + $0x38] sm:$0xff]  ;;  %v2288_v46 = vld [vmem:[%s3668_s9 + $0x20] sm:$0xff] }
  0xf8   :  { %842 = vmatpush.bf16.msrb.mxu0 %v2291_v42 }
  0xf9   :  { %1352 = vperm.xlu2 %2319, %v110_v11  }
  0xfc   :  { %843 = vmatpush.bf16.msrb.mxu0 %v2290_v15 }
  0xfe   :  { %v281_v53 = vpop.f32.mrf.mxu0 }
 0x100   :  { %844 = vmatpush.bf16.msrb.mxu0 %v2289_v44 }
 0x101   :  { %1367 = vperm.xlu2 %2319, %v113_v39  }
 0x104   :  { %845 = vmatpush.bf16.msrb.mxu0 %v2288_v46 }
 0x106   :  { %v283_v59 = vpop.f32.mrf.mxu0 }
 0x107   :  { %v410_v24 = vpack.c.bf16 %v283_v59, %v281_v53  ;;  %v2774_v53 = vld [vmem:[%s3665_s0 + $0x38] sm:$0xff]  ;;  %v369_v59 = vpop.f32.mrf.mxu1 }
 0x108   :  { %846 = vmatpush.bf16.msrb.mxu0 %v2287_v49  ;;  %v2818_v49 = vpop.permute.xlu0 %541 }
 0x10c   :  { %847 = vmatpush.bf16.msrb.mxu0 %v2286_v52 }
 0x10e   :  { %v286_v1 = vpop.f32.mrf.mxu0 }
 0x10f   :  { %v371_v62 = vpop.f32.mrf.mxu1 }
 0x110   :  { %848 = vmatpush.bf16.msrb.mxu0 %v2285_v55 }
 0x114   :  { %849 = vmatpush.bf16.msrb.mxu0 %v2284_v57 }
 0x116   :  { %v288_v6 = vpop.f32.mrf.mxu0 }
 0x117   :  { %v411_v7 = vpack.c.bf16 %v288_v6, %v286_v1  ;;  %v2795_v1 = vld [vmem:[%s3666_s7] ss:$0 sm:$0xff] }
 0x119   :  { %460 = vmatpush.bf16.msra.mxu2 %v411_v7  ;;  %v374_v7 = vpop.f32.mrf.mxu1 }
 0x11d   :  { %461 = vmatpush.bf16.msra.mxu2 %v410_v24 }
 0x121   :  { %462 = vmatpush.bf16.msra.mxu2 %v409_v25  ;;  %v376_v28 = vpop.f32.mrf.mxu1 }
 0x125   :  { %463 = vmatpush.bf16.msra.mxu2 %v408_v30 }
 0x129   :  { %464 = vmatpush.bf16.msra.mxu2 %v407_v31  ;;  %v2805_v31 = vpop.permute.xlu1 %526  ;;  %v379_v21 = vpop.f32.mrf.mxu1 }
 0x12d   :  { %465 = vmatpush.bf16.msra.mxu2 %v406_v29 }
 0x131   :  { %466 = vmatpush.bf16.msra.mxu2 %v405_v32  ;;  %v2810_v32 = vpop.permute.xlu2 %531  ;;  %v381_v42 = vpop.f32.mrf.mxu1 }
 0x132   :  { %v2821_v54 = vpop.permute.xlu1 %546 }
 0x135   :  { %467 = vmatpush.bf16.msra.mxu2 %v404_v37 }
 0x138   :  { %468 = vmatmul.bf16.vlgmr.msra.gmra.mxu2 %v2669_v23 }
 0x139   :  { %v2813_v11 = vpop.permute.xlu2 %536  ;;  %v384_v51 = vpop.f32.mrf.mxu1 }
 0x148   :  { %473 = vmatmul.bf16.gmra.mxu2 %v2685_v10 }
 0x158   :  { %478 = vmatmul.bf16.gmra.mxu2 %v2698_v38 }
 0x168   :  { %483 = vmatmul.bf16.gmra.mxu2 %v2711_v40 }
 0x178   :  { %488 = vmatmul.bf16.gmra.mxu2 %v2718_v12 }
 0x188   :  { %493 = vmatmul.bf16.gmra.mxu2 %v2725_v41 }
 0x198   :  { %498 = vmatmul.bf16.gmra.mxu2 %v2756_v47 }
 0x1a8   :  { %503 = vmatmul.bf16.gmra.mxu2 %v2774_v53 }
 0x1bb   :  { %v469_v61 = vpop.f32.mrf.mxu2 }
 0x1bc   :  { %v589_v63 = vmul.f32 %v2789_v60, %v469_v61  ;;  %v386_v61 = vpop.f32.mrf.mxu1 }
 0x1be   :  { %v605_v0 = vadd.f32 %v589_v63, %v364_v50 }
 0x1c0   :  { %v625_v6 = vadd.f32 %v2795_v1, %v605_v0 }
 0x1c2   :  { %v641_v22 = vmax.f32 %v625_v6, 0.0  ;;  %v2829_v6 = vpop.permute.xlu0 %556 }
 0x1c3   :  { %v471_v3 = vpop.f32.mrf.mxu2 }
 0x1c4   :  { %v590_v4 = vmul.f32 %v2797_v2, %v471_v3 }
 0x1c6   :  { %v606_v5 = vadd.f32 %v590_v4, %v366_v58  ;;  %v2826_v4 = vpop.permute.xlu2 %551 }
 0x1c8   :  { %v626_v19 = vadd.f32 %v2795_v1, %v606_v5 }
 0x1ca   :  { %v642_v24 = vmax.f32 %v626_v19, 0.0 }
 0x1cb   :  { %v474_v8 = vpop.f32.mrf.mxu2 }
 0x1cc   :  { %v657_v25 = vpack.c.bf16 %v642_v24, %v641_v22  ;;  %v591_v27 = vmul.f32 %v2802_v20, %v474_v8  ;;  %v389_v22 = vpop.f32.mrf.mxu1 }
 0x1ce   :  { %737 = vmatmul.bf16.vlgmr.msra.gmra.mxu3 %v657_v25  ;;  %850 = vmatmul.bf16.vlgmr.msrb.gmra.mxu0 %v657_v25  ;;  %v607_v30 = vadd.f32 %v591_v27, %v369_v59 }
 0x1d0   :  { %v627_v29 = vadd.f32 %v2795_v1, %v607_v30 }
 0x1d2   :  { %v643_v35 = vmax.f32 %v627_v29, 0.0 }
 0x1d3   :  { %v476_v33 = vpop.f32.mrf.mxu2 }
 0x1d4   :  { %v592_v34 = vmul.f32 %v2805_v31, %v476_v33  ;;  %v391_v29 = vpop.f32.mrf.mxu1 }
 0x1d6   :  { %v608_v36 = vadd.f32 %v592_v34, %v371_v62 }
 0x1d8   :  { %v628_v9 = vadd.f32 %v2795_v1, %v608_v36  ;;  %v2834_v36 = vpop.permute.xlu1 %561 }
 0x1da   :  { %v644_v37 = vmax.f32 %v628_v9, 0.0 }
 0x1db   :  { %v479_v18 = vpop.f32.mrf.mxu2 }
 0x1dc   :  { %v658_v16 = vpack.c.bf16 %v644_v37, %v643_v35  ;;  %v593_v17 = vmul.f32 %v2810_v32, %v479_v18  ;;  %v2837_v37 = vpop.permute.xlu2 %566 }
 0x1de   :  { %742 = vmatmul.bf16.gmra.mxu3 %v658_v16  ;;  %855 = vmatmul.bf16.gmra.mxu0 %v658_v16  ;;  %v609_v26 = vadd.f32 %v593_v17, %v374_v7 }
 0x1e0   :  { %v629_v15 = vadd.f32 %v2795_v1, %v609_v26  ;;  %v394_v26 = vpop.f32.mrf.mxu1 }
 0x1e2   :  { %v645_v44 = vmax.f32 %v629_v15, 0.0 }
 0x1e3   :  { %v481_v39 = vpop.f32.mrf.mxu2 }
 0x1e4   :  { %v594_v13 = vmul.f32 %v2813_v11, %v481_v39 }
 0x1e6   :  { %v610_v14 = vadd.f32 %v594_v13, %v376_v28 }
 0x1e8   :  { %v630_v43 = vadd.f32 %v2795_v1, %v610_v14 }
 0x1ea   :  { %v646_v45 = vmax.f32 %v630_v43, 0.0  ;;  %v2842_v43 = vpop.permute.xlu0 %571 }
 0x1eb   :  { %v484_v46 = vpop.f32.mrf.mxu2 }
 0x1ec   :  { %v659_v48 = vpack.c.bf16 %v646_v45, %v645_v44  ;;  %v595_v50 = vmul.f32 %v2818_v49, %v484_v46  ;;  %v396_v45 = vpop.f32.mrf.mxu1 }
 0x1ee   :  { %747 = vmatmul.bf16.gmra.mxu3 %v659_v48  ;;  %860 = vmatmul.bf16.gmra.mxu0 %v659_v48  ;;  %v611_v52 = vadd.f32 %v595_v50, %v379_v21  ;;  %v2845_v48 = vpop.permute.xlu1 %576 }
 0x1f0   :  { %v631_v58 = vadd.f32 %v2795_v1, %v611_v52 }
 0x1f2   :  { %v647_v62 = vmax.f32 %v631_v58, 0.0 }
 0x1f3   :  { %v486_v55 = vpop.f32.mrf.mxu2 }
 0x1f4   :  { %v596_v56 = vmul.f32 %v2821_v54, %v486_v55 }
 0x1f6   :  { %v612_v57 = vadd.f32 %v596_v56, %v381_v42 }
 0x1f8   :  { %v632_v59 = vadd.f32 %v2795_v1, %v612_v57 }
 0x1fa   :  { %v648_v63 = vmax.f32 %v632_v59, 0.0  ;;  %v399_v59 = vpop.f32.mrf.mxu1 }
 0x1fb   :  { %v489_v0 = vpop.f32.mrf.mxu2 }
 0x1fc   :  { %v660_v3 = vpack.c.bf16 %v648_v63, %v647_v62  ;;  %v597_v5 = vmul.f32 %v2826_v4, %v489_v0  ;;  %v2850_v63 = vpop.permute.xlu2 %581 }
 0x1fe   :  { %752 = vmatmul.bf16.gmra.mxu3 %v660_v3  ;;  %865 = vmatmul.bf16.gmra.mxu0 %v660_v3  ;;  %v613_v7 = vadd.f32 %v597_v5, %v384_v51  ;;  %v2853_v5 = vpop.permute.xlu0 %586 }
 0x200   :  { %v633_v25 = vadd.f32 %v2795_v1, %v613_v7 }
 0x202   :  { %v649_v28 = vmax.f32 %v633_v25, 0.0 }
 0x203   :  { %v491_v19 = vpop.f32.mrf.mxu2 }
 0x204   :  { %v598_v24 = vmul.f32 %v2829_v6, %v491_v19 }
 0x206   :  { %v614_v8 = vadd.f32 %v598_v24, %v386_v61 }
 0x208   :  { %v634_v27 = vadd.f32 %v2795_v1, %v614_v8 }
 0x20a   :  { %v650_v30 = vmax.f32 %v634_v27, 0.0 }
 0x20b   :  { %v494_v33 = vpop.f32.mrf.mxu2 }
 0x20c   :  { %v661_v34 = vpack.c.bf16 %v650_v30, %v649_v28  ;;  %v599_v9 = vmul.f32 %v2834_v36, %v494_v33 }
 0x20e   :  { %757 = vmatmul.bf16.gmra.mxu3 %v661_v34  ;;  %870 = vmatmul.bf16.gmra.mxu0 %v661_v34  ;;  %v615_v35 = vadd.f32 %v599_v9, %v389_v22  ;;  %v401_v22 = vpop.f32.mrf.mxu1 }
 0x210   :  { %v635_v17 = vadd.f32 %v2795_v1, %v615_v35 }
 0x212   :  { %v651_v13 = vmax.f32 %v635_v17, 0.0 }
 0x213   :  { %v496_v18 = vpop.f32.mrf.mxu2 }
 0x214   :  { %v600_v21 = vmul.f32 %v2837_v37, %v496_v18 }
 0x216   :  { %v616_v16 = vadd.f32 %v600_v21, %v391_v29 }
 0x218   :  { %v636_v39 = vadd.f32 %v2795_v1, %v616_v16 }
 0x21a   :  { %v652_v42 = vmax.f32 %v636_v39, 0.0 }
 0x21b   :  { %v499_v14 = vpop.f32.mrf.mxu2 }
 0x21c   :  { %v662_v15 = vpack.c.bf16 %v652_v42, %v651_v13  ;;  %v601_v44 = vmul.f32 %v2842_v43, %v499_v14 }
 0x21e   :  { %762 = vmatmul.bf16.gmra.mxu3 %v662_v15  ;;  %875 = vmatmul.bf16.gmra.mxu0 %v662_v15  ;;  %v617_v46 = vadd.f32 %v601_v44, %v394_v26 }
 0x220   :  { %v637_v55 = vadd.f32 %v2795_v1, %v617_v46 }
 0x222   :  { %v653_v57 = vmax.f32 %v637_v55, 0.0 }
 0x223   :  { %v501_v50 = vpop.f32.mrf.mxu2 }
 0x224   :  { %v602_v51 = vmul.f32 %v2845_v48, %v501_v50 }
 0x226   :  { %v618_v52 = vadd.f32 %v602_v51, %v396_v45 }
 0x228   :  { %v638_v56 = vadd.f32 %v2795_v1, %v618_v52 }
 0x22a   :  { %v654_v58 = vmax.f32 %v638_v56, 0.0 }
 0x22b   :  { %v504_v61 = vpop.f32.mrf.mxu2 }
 0x22c   :  { %v663_v62 = vpack.c.bf16 %v654_v58, %v653_v57  ;;  %v603_v0 = vmul.f32 %v2850_v63, %v504_v61  ;;  %v2299_v57 = vld [vmem:[%s3670_s11 + $0x38] sm:$0xff]  ;;  %v2298_v58 = vld [vmem:[%s3670_s11 + $0x30] sm:$0xff]  ;;  %v2296_v61 = vld [vmem:[%s3670_s11 + $0x20] sm:$0xff] }
 0x22d   :  { %1072 = vmatpush.bf16.msrb.mxu2 %v2299_v57 }
 0x22e   :  { %767 = vmatmul.bf16.gmra.mxu3 %v663_v62  ;;  %880 = vmatmul.bf16.gmra.mxu0 %v663_v62  ;;  %v619_v3 = vadd.f32 %v603_v0, %v399_v59  ;;  %v2297_v59 = vld [vmem:[%s3670_s11 + $0x28] sm:$0xff]  ;;  %v2295_v62 = vld [vmem:[%s3670_s11 + $0x18] sm:$0xff] }
 0x230   :  { %v639_v8 = vadd.f32 %v2795_v1, %v619_v3  ;;  %v2294_v3 = vld [vmem:[%s3670_s11 + $0x10] sm:$0xff] }
 0x231   :  { %1073 = vmatpush.bf16.msrb.mxu2 %v2298_v58 }
 0x232   :  { %v655_v27 = vmax.f32 %v639_v8, 0.0 }
 0x233   :  { %v506_v7 = vpop.f32.mrf.mxu2 }
 0x234   :  { %v604_v19 = vmul.f32 %v2853_v5, %v506_v7  ;;  %v2293_v7 = vld [vmem:[%s3670_s11 + $0x8] sm:$0xff] }
 0x235   :  { %1074 = vmatpush.bf16.msrb.mxu2 %v2297_v59 }
 0x236   :  { %v620_v24 = vadd.f32 %v604_v19, %v401_v22  ;;  %v2292_v19 = vld [vmem:[%s3670_s11] sm:$0xff] }
 0x238   :  { %v640_v25 = vadd.f32 %v2795_v1, %v620_v24 }
 0x239   :  { %1075 = vmatpush.bf16.msrb.mxu2 %v2296_v61 }
 0x23a   :  { %v656_v28 = vmax.f32 %v640_v25, 0.0 }
 0x23c   :  { %v664_v30 = vpack.c.bf16 %v656_v28, %v655_v27 }
 0x23d   :  { %1076 = vmatpush.bf16.msrb.mxu2 %v2295_v62 }
 0x23e   :  { %772 = vmatmul.bf16.gmra.mxu3 %v664_v30  ;;  %885 = vmatmul.bf16.gmra.mxu0 %v664_v30 }
 0x241   :  { %1077 = vmatpush.bf16.msrb.mxu2 %v2294_v3 }
 0x245   :  { %1078 = vmatpush.bf16.msrb.mxu2 %v2293_v7 }
 0x249   :  { %1079 = vmatpush.bf16.msrb.mxu2 %v2292_v19 }
 0x24b   :  { %v851_v0 = vpop.f32.mrf.mxu0 }
 0x251   :  { %v738_v33 = vpop.f32.mrf.mxu3 }
 0x253   :  { %v853_v22 = vpop.f32.mrf.mxu0 }
 0x259   :  { %v740_v34 = vpop.f32.mrf.mxu3 }
 0x25a   :  { %v891_v56 = vpack.c.bf16 %v740_v34, %v738_v33  ;;  %v2894_v33 = vld [vmem:[%s3669_s10] ss:$0 sm:$0xff] }
 0x25b   :  { %v856_v24 = vpop.f32.mrf.mxu0 }
 0x261   :  { %v743_v29 = vpop.f32.mrf.mxu3 }
 0x263   :  { %v858_v25 = vpop.f32.mrf.mxu0 }
 0x269   :  { %v745_v9 = vpop.f32.mrf.mxu3 }
 0x26a   :  { %v892_v55 = vpack.c.bf16 %v745_v9, %v743_v29 }
 0x26b   :  { %v861_v9 = vpop.f32.mrf.mxu0 }
 0x271   :  { %v748_v35 = vpop.f32.mrf.mxu3 }
 0x279   :  { %v750_v18 = vpop.f32.mrf.mxu3 }
 0x27a   :  { %v893_v52 = vpack.c.bf16 %v750_v18, %v748_v35 }
 0x281   :  { %v753_v21 = vpop.f32.mrf.mxu3 }
 0x289   :  { %v755_v16 = vpop.f32.mrf.mxu3 }
 0x28a   :  { %v894_v51 = vpack.c.bf16 %v755_v16, %v753_v21 }
 0x291   :  { %v758_v17 = vpop.f32.mrf.mxu3 }
 0x299   :  { %v760_v26 = vpop.f32.mrf.mxu3 }
 0x29a   :  { %v895_v50 = vpack.c.bf16 %v760_v26, %v758_v17  ;;  %v863_v17 = vpop.f32.mrf.mxu0 }
 0x2a1   :  { %v763_v39 = vpop.f32.mrf.mxu3 }
 0x2a9   :  { %v765_v13 = vpop.f32.mrf.mxu3 }
 0x2aa   :  { %v896_v46 = vpack.c.bf16 %v765_v13, %v763_v39 }
 0x2b1   :  { %v768_v42 = vpop.f32.mrf.mxu3 }
 0x2b9   :  { %v770_v14 = vpop.f32.mrf.mxu3 }
 0x2ba   :  { %v897_v45 = vpack.c.bf16 %v770_v14, %v768_v42 }
 0x2c1   :  { %v773_v1 = vpop.f32.mrf.mxu3 }
 0x2c9   :  { %v775_v15 = vpop.f32.mrf.mxu3 }
 0x2ca   :  { %v898_v44 = vpack.c.bf16 %v775_v15, %v773_v1  ;;  %v866_v15 = vpop.f32.mrf.mxu0 }
 0x2cc   :  { %899 = vmatpush.bf16.msrb.mxu1 %v898_v44 }
 0x2d0   :  { %900 = vmatpush.bf16.msrb.mxu1 %v897_v45 }
 0x2d4   :  { %901 = vmatpush.bf16.msrb.mxu1 %v896_v46 }
 0x2d8   :  { %902 = vmatpush.bf16.msrb.mxu1 %v895_v50 }
 0x2dc   :  { %903 = vmatpush.bf16.msrb.mxu1 %v894_v51  ;;  %v868_v51 = vpop.f32.mrf.mxu0 }
 0x2e0   :  { %904 = vmatpush.bf16.msrb.mxu1 %v893_v52 }
 0x2e4   :  { %905 = vmatpush.bf16.msrb.mxu1 %v892_v55  ;;  %v871_v58 = vpop.f32.mrf.mxu0 }
 0x2e8   :  { %906 = vmatpush.bf16.msrb.mxu1 %v891_v56 }
 0x2eb   :  { %907 = vmatmul.bf16.vlgmr.msrb.gmra.mxu1 %v2669_v23 }
 0x2ec   :  { %v873_v7 = vpop.f32.mrf.mxu0 }
 0x2fb   :  { %912 = vmatmul.bf16.gmra.mxu1 %v2685_v10 }
 0x30b   :  { %917 = vmatmul.bf16.gmra.mxu1 %v2698_v38 }
 0x31b   :  { %922 = vmatmul.bf16.gmra.mxu1 %v2711_v40 }
 0x32b   :  { %927 = vmatmul.bf16.gmra.mxu1 %v2718_v12 }
 0x33b   :  { %932 = vmatmul.bf16.gmra.mxu1 %v2725_v41 }
 0x34b   :  { %937 = vmatmul.bf16.gmra.mxu1 %v2756_v47 }
 0x35b   :  { %942 = vmatmul.bf16.gmra.mxu1 %v2774_v53 }
 0x368   :  { %v908_v8 = vpop.f32.mrf.mxu1 }
 0x369   :  { %v948_v27 = vmul.f32 %v908_v8, %v2789_v60  ;;  %v876_v8 = vpop.f32.mrf.mxu0 }
 0x36b   :  { %v964_v30 = vadd.f32 %v948_v27, %v851_v0 }
 0x36d   :  { %v984_v35 = vadd.f32 %v2894_v33, %v964_v30 }
 0x370   :  { %v910_v28 = vpop.f32.mrf.mxu1 }
 0x371   :  { %v949_v34 = vmul.f32 %v910_v28, %v2797_v2 }
 0x373   :  { %v965_v29 = vadd.f32 %v949_v34, %v853_v22 }
 0x375   :  { %v985_v18 = vadd.f32 %v2894_v33, %v965_v29 }
 0x377   :  { %v1000_v21 = vpack.c.bf16 %v985_v18, %v984_v35 }
 0x378   :  { %v913_v16 = vpop.f32.mrf.mxu1 }
 0x379   :  { %1080 = vmatmul.bf16.vlgmr.msrb.gmra.mxu2 %v1000_v21  ;;  %v950_v60 = vmul.f32 %v913_v16, %v2802_v20 }
 0x37b   :  { %v966_v39 = vadd.f32 %v950_v60, %v856_v24 }
 0x37d   :  { %v986_v14 = vadd.f32 %v2894_v33, %v966_v39 }
 0x380   :  { %v915_v26 = vpop.f32.mrf.mxu1 }
 0x381   :  { %v951_v13 = vmul.f32 %v915_v26, %v2805_v31 }
 0x383   :  { %v967_v42 = vadd.f32 %v951_v13, %v858_v25 }
 0x385   :  { %v987_v2 = vadd.f32 %v2894_v33, %v967_v42 }
 0x387   :  { %v1001_v1 = vpack.c.bf16 %v987_v2, %v986_v14 }
 0x388   :  { %v918_v44 = vpop.f32.mrf.mxu1 }
 0x389   :  { %1085 = vmatmul.bf16.gmra.mxu2 %v1001_v1  ;;  %v952_v45 = vmul.f32 %v918_v44, %v2810_v32 }
 0x38b   :  { %v968_v50 = vadd.f32 %v952_v45, %v861_v9  ;;  %v878_v9 = vpop.f32.mrf.mxu0 }
 0x38d   :  { %v988_v55 = vadd.f32 %v2894_v33, %v968_v50 }
 0x390   :  { %v920_v46 = vpop.f32.mrf.mxu1 }
 0x391   :  { %v953_v20 = vmul.f32 %v920_v46, %v2813_v11 }
 0x393   :  { %v969_v52 = vadd.f32 %v953_v20, %v863_v17  ;;  %v881_v60 = vpop.f32.mrf.mxu0 }
 0x395   :  { %v989_v31 = vadd.f32 %v2894_v33, %v969_v52 }
 0x397   :  { %v1002_v56 = vpack.c.bf16 %v989_v31, %v988_v55 }
 0x398   :  { %v923_v57 = vpop.f32.mrf.mxu1 }
 0x399   :  { %1090 = vmatmul.bf16.gmra.mxu2 %v1002_v56  ;;  %v954_v59 = vmul.f32 %v923_v57, %v2818_v49 }
 0x39b   :  { %v970_v62 = vadd.f32 %v954_v59, %v866_v15  ;;  %v883_v42 = vpop.f32.mrf.mxu0 }
 0x39d   :  { %v990_v3 = vadd.f32 %v2894_v33, %v970_v62 }
 0x3a0   :  { %v925_v61 = vpop.f32.mrf.mxu1 }
 0x3a1   :  { %v955_v32 = vmul.f32 %v925_v61, %v2821_v54 }
 0x3a3   :  { %v971_v0 = vadd.f32 %v955_v32, %v868_v51  ;;  %v886_v45 = vpop.f32.mrf.mxu0 }
 0x3a5   :  { %v991_v11 = vadd.f32 %v2894_v33, %v971_v0 }
 0x3a7   :  { %v1003_v19 = vpack.c.bf16 %v991_v11, %v990_v3 }
 0x3a8   :  { %v928_v22 = vpop.f32.mrf.mxu1 }
 0x3a9   :  { %1095 = vmatmul.bf16.gmra.mxu2 %v1003_v19  ;;  %v956_v24 = vmul.f32 %v928_v22, %v2826_v4  ;;  %v2955_v22 = vpop.permute.xlu2 %1198 }
 0x3aa   :  { %3718 = vst [vmem:[#allocation3_spill] sm:$0xff] %v2955_v22 }
 0x3ab   :  { %v972_v27 = vadd.f32 %v956_v24, %v871_v58  ;;  %v888_v52 = vpop.f32.mrf.mxu0 }
 0x3ad   :  { %v992_v30 = vadd.f32 %v2894_v33, %v972_v27 }
 0x3b0   :  { %v930_v25 = vpop.f32.mrf.mxu1 }
 0x3b1   :  { %v957_v49 = vmul.f32 %v930_v25, %v2829_v6  ;;  %v2961_v25 = vpop.permute.xlu0 %1183  ;;  %v2963_v27 = vpop.permute.xlu2 %1173 }
 0x3b3   :  { %v973_v28 = vadd.f32 %v957_v49, %v873_v7  ;;  %v2951_v7 = vpop.permute.xlu1 %1193 }
 0x3b4   :  { %3717 = vst [vmem:[#allocation2_spill] sm:$0xff] %v2951_v7 }
 0x3b5   :  { %v993_v54 = vadd.f32 %v2894_v33, %v973_v28 }
 0x3b7   :  { %v1004_v34 = vpack.c.bf16 %v993_v54, %v992_v30 }
 0x3b8   :  { %v933_v29 = vpop.f32.mrf.mxu1 }
 0x3b9   :  { %1100 = vmatmul.bf16.gmra.mxu2 %v1004_v34  ;;  %v958_v35 = vmul.f32 %v933_v29, %v2834_v36  ;;  %v2969_v30 = vpop.permute.xlu0 %1178 }
 0x3bb   :  { %v974_v21 = vadd.f32 %v958_v35, %v876_v8  ;;  %v2959_v8 = vpop.permute.xlu1 %1188 }
 0x3bd   :  { %v994_v17 = vadd.f32 %v2894_v33, %v974_v21 }
 0x3c0   :  { %v935_v18 = vpop.f32.mrf.mxu1 }
 0x3c1   :  { %v959_v4 = vmul.f32 %v935_v18, %v2837_v37 }
 0x3c3   :  { %v975_v16 = vadd.f32 %v959_v4, %v878_v9  ;;  %v2967_v28 = vpop.permute.xlu1 %1163  ;;  %v2977_v9 = vpop.permute.xlu2 %1168 }
 0x3c5   :  { %v995_v6 = vadd.f32 %v2894_v33, %v975_v16 }
 0x3c7   :  { %v1005_v26 = vpack.c.bf16 %v995_v6, %v994_v17  ;;  %v2987_v17 = vpop.permute.xlu0 %1153 }
 0x3c8   :  { %v938_v39 = vpop.f32.mrf.mxu1  ;;  %3720 = vst [vmem:[#allocation5_spill] sm:$0xff] %v2987_v17 }
 0x3c9   :  { %1105 = vmatmul.bf16.gmra.mxu2 %v1005_v26  ;;  %v960_v13 = vmul.f32 %v938_v39, %v2842_v43 }
 0x3cb   :  { %v976_v2 = vadd.f32 %v960_v13, %v881_v60  ;;  %v2983_v4 = vpop.permute.xlu1 %1158  ;;  %v2993_v13 = vpop.permute.xlu2 %1143 }
 0x3cc   :  { %3719 = vst [vmem:[#allocation4_spill] sm:$0xff] %v2983_v4 }
 0x3cd   :  { %v996_v15 = vadd.f32 %v2894_v33, %v976_v2 }
 0x3d0   :  { %v940_v14 = vpop.f32.mrf.mxu1 }
 0x3d1   :  { %v961_v36 = vmul.f32 %v940_v14, %v2845_v48 }
 0x3d3   :  { %v977_v1 = vadd.f32 %v961_v36, %v883_v42  ;;  %v2999_v36 = vpop.permute.xlu1 %1133 }
 0x3d5   :  { %v997_v37 = vadd.f32 %v2894_v33, %v977_v1 }
 0x3d7   :  { %v1006_v44 = vpack.c.bf16 %v997_v37, %v996_v15  ;;  %v3003_v15 = vpop.permute.xlu0 %1148 }
 0x3d8   :  { %v943_v46 = vpop.f32.mrf.mxu1  ;;  %3721 = vst [vmem:[#allocation6_spill] sm:$0xff] %v3003_v15 }
 0x3d9   :  { %1110 = vmatmul.bf16.gmra.mxu2 %v1006_v44  ;;  %v962_v50 = vmul.f32 %v943_v46, %v2850_v63  ;;  %v3009_v46 = vpop.permute.xlu2 %1138 }
 0x3db   :  { %v978_v51 = vadd.f32 %v962_v50, %v886_v45 }
 0x3dd   :  { %v998_v31 = vadd.f32 %v2894_v33, %v978_v51 }
 0x3e0   :  { %v945_v20 = vpop.f32.mrf.mxu1 }
 0x3e1   :  { %v963_v43 = vmul.f32 %v945_v20, %v2853_v5 }
 0x3e3   :  { %v979_v55 = vadd.f32 %v963_v43, %v888_v52  ;;  %v3015_v43 = vpop.permute.xlu1 %1128 }
 0x3e5   :  { %v999_v48 = vadd.f32 %v2894_v33, %v979_v55 }
 0x3e7   :  { %v1007_v56 = vpack.c.bf16 %v999_v48, %v998_v31  ;;  %v3019_v31 = vpop.permute.xlu0 %1123 }
 0x3e9   :  { %1115 = vmatmul.bf16.gmra.mxu2 %v1007_v56 }
 0x3fc   :  { %v2927_v57 = vpop.f32.mrf.mxu2 }
 0x3fd   :  { %v1201_v48 = vmul.f32 %v3019_v31, %v2927_v57 }
 0x404   :  { %v2929_v58 = vpop.f32.mrf.mxu2 }
 0x405   :  { %v1202_v55 = vmul.f32 %v3015_v43, %v2929_v58 }
 0x407   :  { %v1217_v56 = vpack.c.bf16 %v1202_v55, %v1201_v48  ;;  %v2208_v55 = vld [vmem:[%s3672_s13 + $0x38] sm:$0xf0] }
 0x40c   :  { %v2931_v59 = vpop.f32.mrf.mxu2 }
 0x40d   :  { %v1203_v51 = vmul.f32 %v2999_v36, %v2931_v59 }
 0x414   :  { %v2933_v61 = vpop.f32.mrf.mxu2 }
 0x415   :  { %v1204_v20 = vmul.f32 %v3009_v46, %v2933_v61 }
 0x417   :  { %v1218_v52 = vpack.c.bf16 %v1204_v20, %v1203_v51  ;;  %v2307_v20 = vld [vmem:[%s3672_s13 + $0x34] sm:$0xf0]  ;;  %v2306_v51 = vld [vmem:[%s3672_s13 + $0x34] sm:$0xf] }
 0x418   :  { %v2211_v48 = vor.u32 %v2306_v51, %v2208_v55 }
 0x41c   :  { %v2935_v63 = vpop.f32.mrf.mxu2 }
 0x41d   :  { %v1205_v45 = vmul.f32 %v2993_v13, %v2935_v63 }
 0x424   :  { %v2937_v62 = vpop.f32.mrf.mxu2 }
 0x425   :  { %v1206_v44 = vmul.f32 %v3003_v15, %v2937_v62 }
 0x427   :  { %v1219_v50 = vpack.c.bf16 %v1206_v44, %v1205_v45  ;;  %v2216_v45 = vld [vmem:[%s3672_s13 + $0x48] sm:$0xf0] }
 0x42c   :  { %v2939_v5 = vpop.f32.mrf.mxu2 }
 0x42d   :  { %v1207_v1 = vmul.f32 %v2987_v17, %v2939_v5 }
 0x434   :  { %v2941_v32 = vpop.f32.mrf.mxu2 }
 0x435   :  { %v1208_v2 = vmul.f32 %v2983_v4, %v2941_v32 }
 0x437   :  { %v1220_v37 = vpack.c.bf16 %v1208_v2, %v1207_v1  ;;  %v2214_v2 = vld [vmem:[%s3672_s13 + $0x40] sm:$0xf]  ;;  %v2309_v1 = vld [vmem:[%s3672_s13 + $0x44] sm:$0xf0] }
 0x438   :  { %v2215_v44 = vor.u32 %v2309_v1, %v2214_v2  ;;  %v3128_v2 = vpop.permute.xlu2 %1292 }
 0x439   :  { %v1370_v1 = vmul.f32 %v3128_v2, %v2927_v57 }
 0x43c   :  { %v2943_v0 = vpop.f32.mrf.mxu2 }
 0x43d   :  { %v1209_v42 = vmul.f32 %v2967_v28, %v2943_v0 }
 0x444   :  { %v2945_v33 = vpop.f32.mrf.mxu2 }
 0x445   :  { %v1210_v26 = vmul.f32 %v2977_v9, %v2945_v33 }
 0x447   :  { %v1221_v14 = vpack.c.bf16 %v1210_v26, %v1209_v42  ;;  %v2310_v26 = vld [vmem:[%s3672_s13 + $0x54] sm:$0xf] }
 0x44c   :  { %v2947_v3 = vpop.f32.mrf.mxu2 }
 0x44d   :  { %v1211_v6 = vmul.f32 %v2963_v27, %v2947_v3 }
 0x454   :  { %v2949_v11 = vpop.f32.mrf.mxu2 }
 0x455   :  { %v1212_v16 = vmul.f32 %v2969_v30, %v2949_v11 }
 0x457   :  { %v1222_v39 = vpack.c.bf16 %v1212_v16, %v1211_v6  ;;  %v2311_v6 = vld [vmem:[%s3672_s13 + $0x54] sm:$0xf0] }
 0x45c   :  { %v2953_v19 = vpop.f32.mrf.mxu2 }
 0x45d   :  { %v1213_v21 = vmul.f32 %v2961_v25, %v2953_v19 }
 0x464   :  { %v2957_v24 = vpop.f32.mrf.mxu2 }
 0x465   :  { %v1214_v35 = vmul.f32 %v2959_v8, %v2957_v24 }
 0x467   :  { %v1223_v60 = vpack.c.bf16 %v1214_v35, %v1213_v21  ;;  %v2312_v35 = vld [vmem:[%s3672_s13 + $0x64] sm:$0xf] }
 0x46c   :  { %v2965_v49 = vpop.f32.mrf.mxu2 }
 0x46d   :  { %v1215_v34 = vmul.f32 %v2951_v7, %v2965_v49 }
 0x474   :  { %v2971_v54 = vpop.f32.mrf.mxu2 }
 0x475   :  { %v1216_v29 = vmul.f32 %v2955_v22, %v2971_v54 }
 0x477   :  { %v1224_v18 = vpack.c.bf16 %v1216_v29, %v1215_v34  ;;  %v2238_v34 = vld [vmem:[%s3672_s13 + $0x70] sm:$0xf]  ;;  %v2315_v29 = vld [vmem:[%s3672_s13 + $0x74] sm:$0xf0] }
 0x479   :  { %1225 = vmatpush.bf16.msrb.mxu3 %v1224_v18  ;;  %v2232_v18 = vld [vmem:[%s3672_s13 + $0x68] sm:$0xf0] }
 0x47a   :  { %v2235_v16 = vor.u32 %v2312_v35, %v2232_v18  ;;  %v2192_v18 = vld [vmem:[%s3672_s13 + $0x18] sm:$0xf0] }
 0x47d   :  { %1226 = vmatpush.bf16.msrb.mxu3 %v1223_v60  ;;  %v2222_v60 = vld [vmem:[%s3672_s13 + $0x50] sm:$0xf] }
 0x47e   :  { %v2223_v42 = vor.u32 %v2311_v6, %v2222_v60  ;;  %v2301_v60 = vld [vmem:[%s3672_s13 + $0x4] sm:$0xf0]  ;;  %v2300_v6 = vld [vmem:[%s3672_s13 + $0x4] sm:$0xf] }
 0x481   :  { %1227 = vmatpush.bf16.msrb.mxu3 %v1222_v39  ;;  %v2224_v39 = vld [vmem:[%s3672_s13 + $0x58] sm:$0xf0] }
 0x485   :  { %1228 = vmatpush.bf16.msrb.mxu3 %v1221_v14  ;;  %v2227_v14 = vor.u32 %v2310_v26, %v2224_v39  ;;  %v2184_v39 = vld [vmem:[%s3672_s13 + $0x8] sm:$0xf0] }
 0x489   :  { %1229 = vmatpush.bf16.msrb.mxu3 %v1220_v37  ;;  %v2308_v37 = vld [vmem:[%s3672_s13 + $0x44] sm:$0xf] }
 0x48d   :  { %1230 = vmatpush.bf16.msrb.mxu3 %v1219_v50  ;;  %v2219_v50 = vor.u32 %v2308_v37, %v2216_v45  ;;  %v3137_v45 = vpop.permute.xlu0 %1297 }
 0x491   :  { %1231 = vmatpush.bf16.msrb.mxu3 %v1218_v52 }
 0x495   :  { %1232 = vmatpush.bf16.msrb.mxu3 %v1217_v56  ;;  %v2198_v56 = vld [vmem:[%s3672_s13 + $0x20] sm:$0xf] }
 0x498   :  { %1233 = vmatmul.bf16.vlgmr.msrb.gmra.mxu3 %v2669_v23  ;;  %v2314_v23 = vld [vmem:[%s3672_s13 + $0x74] sm:$0xf] }
 0x4a8   :  { %1238 = vmatmul.bf16.gmra.mxu3 %v2685_v10  ;;  %v2239_v10 = vor.u32 %v2315_v29, %v2238_v34  ;;  %v2305_v34 = vld [vmem:[%s3672_s13 + $0x24] sm:$0xf0]  ;;  %v2304_v29 = vld [vmem:[%s3672_s13 + $0x24] sm:$0xf] }
 0x4aa   :  { %1542 = vmatpush.bf16.msra.mxu0 %v2239_v10  ;;  %v2200_v10 = vld [vmem:[%s3672_s13 + $0x28] sm:$0xf0] }
 0x4b8   :  { %1243 = vmatmul.bf16.gmra.mxu3 %v2698_v38  ;;  %v2240_v38 = vld [vmem:[%s3672_s13 + $0x78] sm:$0xf0] }
 0x4c8   :  { %1248 = vmatmul.bf16.gmra.mxu3 %v2711_v40  ;;  %v2230_v40 = vld [vmem:[%s3672_s13 + $0x60] sm:$0xf] }
 0x4d8   :  { %1253 = vmatmul.bf16.gmra.mxu3 %v2718_v12  ;;  %v2313_v12 = vld [vmem:[%s3672_s13 + $0x64] sm:$0xf0] }
 0x4d9   :  { %v2231_v21 = vor.u32 %v2313_v12, %v2230_v40  ;;  %v2190_v40 = vld [vmem:[%s3672_s13 + $0x10] sm:$0xf]  ;;  %v2303_v12 = vld [vmem:[%s3672_s13 + $0x14] sm:$0xf0] }
 0x4da   :  { %v2191_v35 = vor.u32 %v2303_v12, %v2190_v40 }
 0x4db   :  { %1543 = vmatpush.bf16.msra.mxu0 %v2231_v21 }
 0x4df   :  { %1544 = vmatpush.bf16.msra.mxu0 %v2223_v42  ;;  %v2187_v42 = vor.u32 %v2300_v6, %v2184_v39  ;;  %v3157_v39 = vpop.permute.xlu0 %1312 }
 0x4e3   :  { %1545 = vmatpush.bf16.msra.mxu0 %v2215_v44  ;;  %v3135_v44 = vld [vmem:[%s3671_s12] ss:$0 sm:$0xff] }
 0x4e8   :  { %1258 = vmatmul.bf16.gmra.mxu3 %v2725_v41  ;;  %v2243_v41 = vor.u32 %v2314_v23, %v2240_v38  ;;  %v2199_v23 = vor.u32 %v2305_v34, %v2198_v56  ;;  %v2203_v38 = vor.u32 %v2304_v29, %v2200_v10 }
 0x4ea   :  { %1591 = vmatpush.bf16.msra.mxu1 %v2243_v41  ;;  %v2302_v41 = vld [vmem:[%s3672_s13 + $0x14] sm:$0xf] }
 0x4eb   :  { %v2195_v21 = vor.u32 %v2302_v41, %v2192_v18 }
 0x4ee   :  { %1592 = vmatpush.bf16.msra.mxu1 %v2235_v16  ;;  %v2182_v16 = vld [vmem:[%s3672_s13] sm:$0xf] }
 0x4ef   :  { %v2183_v26 = vor.u32 %v2301_v60, %v2182_v16 }
 0x4f2   :  { %1593 = vmatpush.bf16.msra.mxu1 %v2227_v14 }
 0x4f6   :  { %1594 = vmatpush.bf16.msra.mxu1 %v2219_v50 }
 0x4f8   :  { %1263 = vmatmul.bf16.gmra.mxu3 %v2756_v47  ;;  %v2206_v47 = vld [vmem:[%s3672_s13 + $0x30] sm:$0xf] }
 0x4f9   :  { %v2207_v52 = vor.u32 %v2307_v20, %v2206_v47  ;;  %v1371_v47 = vmul.f32 %v3137_v45, %v2929_v58 }
 0x4fa   :  { %1595 = vmatpush.bf16.msra.mxu1 %v2211_v48 }
 0x4fb   :  { %1546 = vmatpush.bf16.msra.mxu0 %v2207_v52 }
 0x4fe   :  { %1596 = vmatpush.bf16.msra.mxu1 %v2203_v38  ;;  %v3149_v38 = vpop.permute.xlu2 %1307 }
 0x4ff   :  { %1547 = vmatpush.bf16.msra.mxu0 %v2199_v23  ;;  %v3145_v23 = vpop.permute.xlu1 %1302  ;;  %v1373_v12 = vmul.f32 %v3149_v38, %v2933_v61  ;;  %v1374_v61 = vmul.f32 %v3157_v39, %v2935_v63 }
 0x500   :  { %v1372_v58 = vmul.f32 %v3145_v23, %v2931_v59 }
 0x502   :  { %1597 = vmatpush.bf16.msra.mxu1 %v2195_v21 }
 0x503   :  { %1548 = vmatpush.bf16.msra.mxu0 %v2191_v35 }
 0x506   :  { %1598 = vmatpush.bf16.msra.mxu1 %v2187_v42 }
 0x507   :  { %1549 = vmatpush.bf16.msra.mxu0 %v2183_v26 }
 0x508   :  { %1268 = vmatmul.bf16.gmra.mxu3 %v2774_v53 }
 0x51b   :  { %v1234_v53 = vpop.f32.mrf.mxu3 }
 0x51c   :  { %v1274_v14 = vmul.f32 %v1234_v53, %v3019_v31  ;;  %v3161_v53 = vpop.permute.xlu1 %1317 }
 0x51d   :  { %3722 = vst [vmem:[#allocation7_spill] sm:$0xff] %v3161_v53 }
 0x51e   :  { %v1386_v37 = vadd.f32 %v1370_v1, %v1274_v14  ;;  %v1375_v1 = vmul.f32 %v3161_v53, %v2937_v62 }
 0x520   :  { %v1406_v51 = vadd.f32 %v3135_v44, %v1386_v37 }
 0x522   :  { %v1422_v57 = vmax.f32 %v1406_v51, 0.0 }
 0x523   :  { %v1236_v50 = vpop.f32.mrf.mxu3 }
 0x524   :  { %v1275_v20 = vmul.f32 %v1236_v50, %v3015_v43 }
 0x526   :  { %v1387_v52 = vadd.f32 %v1371_v47, %v1275_v20 }
 0x528   :  { %v1407_v55 = vadd.f32 %v3135_v44, %v1387_v52 }
 0x52a   :  { %v1423_v48 = vmax.f32 %v1407_v55, 0.0 }
 0x52b   :  { %v1239_v56 = vpop.f32.mrf.mxu3 }
 0x52c   :  { %v1438_v34 = vpack.c.bf16 %v1423_v48, %v1422_v57  ;;  %v1276_v29 = vmul.f32 %v1239_v56, %v2999_v36  ;;  %v3169_v48 = vpop.permute.xlu2 %1322 }
 0x52d   :  { %3723 = vst [vmem:[#allocation8_spill] sm:$0xff] %v3169_v48  ;;  %v1376_v62 = vmul.f32 %v3169_v48, %v2939_v5 }
 0x52e   :  { %1550 = vmatmul.bf16.vlgmr.msra.gmra.mxu0 %v1438_v34  ;;  %1599 = vmatmul.bf16.vlgmr.msra.gmra.mxu1 %v1438_v34  ;;  %v1388_v10 = vadd.f32 %v1372_v58, %v1276_v29  ;;  %v3173_v34 = vpop.permute.xlu0 %1327 }
 0x52f   :  { %3724 = vst [vmem:[#allocation9_spill] sm:$0xff] %v3173_v34  ;;  %v1377_v58 = vmul.f32 %v3173_v34, %v2941_v32 }
 0x530   :  { %v1408_v35 = vadd.f32 %v3135_v44, %v1388_v10 }
 0x532   :  { %v1424_v16 = vmax.f32 %v1408_v35, 0.0 }
 0x533   :  { %v1241_v40 = vpop.f32.mrf.mxu3 }
 0x534   :  { %v1277_v41 = vmul.f32 %v1241_v40, %v3009_v46 }
 0x536   :  { %v1389_v18 = vadd.f32 %v1373_v12, %v1277_v41 }
 0x538   :  { %v1409_v21 = vadd.f32 %v3135_v44, %v1389_v18 }
 0x53a   :  { %v1425_v60 = vmax.f32 %v1409_v21, 0.0 }
 0x53b   :  { %v1244_v6 = vpop.f32.mrf.mxu3 }
 0x53c   :  { %v1439_v26 = vpack.c.bf16 %v1425_v60, %v1424_v16  ;;  %v1278_v59 = vmul.f32 %v1244_v6, %v2993_v13  ;;  %v3181_v60 = vpop.permute.xlu1 %1332 }
 0x53d   :  { %3725 = vst [vmem:[#allocation10_spill] sm:$0xff] %v3181_v60  ;;  %v1378_v32 = vmul.f32 %v3181_v60, %v2943_v0 }
 0x53e   :  { %1555 = vmatmul.bf16.gmra.mxu0 %v1439_v26  ;;  %1604 = vmatmul.bf16.gmra.mxu1 %v1439_v26  ;;  %v1390_v42 = vadd.f32 %v1374_v61, %v1278_v59  ;;  %v3185_v26 = vpop.permute.xlu2 %1337 }
 0x53f   :  { %3726 = vst [vmem:[#allocation11_spill] sm:$0xff] %v3185_v26  ;;  %v1379_v61 = vmul.f32 %v3185_v26, %v2945_v33 }
 0x540   :  { %v1410_v50 = vadd.f32 %v3135_v44, %v1390_v42 }
 0x542   :  { %v1426_v51 = vmax.f32 %v1410_v50, 0.0 }
 0x543   :  { %v1246_v14 = vpop.f32.mrf.mxu3 }
 0x544   :  { %v1279_v37 = vmul.f32 %v1246_v14, %v3003_v15 }
 0x546   :  { %v1391_v47 = vadd.f32 %v1375_v1, %v1279_v37 }
 0x548   :  { %v1411_v20 = vadd.f32 %v3135_v44, %v1391_v47 }
 0x54a   :  { %v1427_v52 = vmax.f32 %v1411_v20, 0.0 }
 0x54b   :  { %v1249_v55 = vpop.f32.mrf.mxu3 }
 0x54c   :  { %v1440_v57 = vpack.c.bf16 %v1427_v52, %v1426_v51  ;;  %v1280_v63 = vmul.f32 %v1249_v55, %v2987_v17  ;;  %v3193_v52 = vpop.permute.xlu0 %1342 }
 0x54d   :  { %3727 = vst [vmem:[#allocation12_spill] sm:$0xff] %v3193_v52  ;;  %v1380_v33 = vmul.f32 %v3193_v52, %v2947_v3 }
 0x54e   :  { %1560 = vmatmul.bf16.gmra.mxu0 %v1440_v57  ;;  %1609 = vmatmul.bf16.gmra.mxu1 %v1440_v57  ;;  %v1392_v56 = vadd.f32 %v1376_v62, %v1280_v63  ;;  %v3197_v57 = vpop.permute.xlu1 %1347 }
 0x54f   :  { %3728 = vst [vmem:[#allocation13_spill] sm:$0xff] %v3197_v57  ;;  %v1381_v62 = vmul.f32 %v3197_v57, %v2949_v11 }
 0x550   :  { %v1412_v40 = vadd.f32 %v3135_v44, %v1392_v56 }
 0x552   :  { %v1428_v35 = vmax.f32 %v1412_v40, 0.0 }
 0x553   :  { %v1251_v29 = vpop.f32.mrf.mxu3 }
 0x554   :  { %v1281_v10 = vmul.f32 %v1251_v29, %v2983_v4 }
 0x556   :  { %v1393_v12 = vadd.f32 %v1377_v58, %v1281_v10 }
 0x558   :  { %v1413_v41 = vadd.f32 %v3135_v44, %v1393_v12 }
 0x55a   :  { %v1429_v18 = vmax.f32 %v1413_v41, 0.0 }
 0x55b   :  { %v1254_v21 = vpop.f32.mrf.mxu3 }
 0x55c   :  { %v1441_v16 = vpack.c.bf16 %v1429_v18, %v1428_v35  ;;  %v1282_v5 = vmul.f32 %v1254_v21, %v2967_v28  ;;  %v3205_v18 = vpop.permute.xlu2 %1352 }
 0x55d   :  { %3729 = vst [vmem:[#allocation14_spill] sm:$0xff] %v3205_v18  ;;  %v1382_v11 = vmul.f32 %v3205_v18, %v2953_v19 }
 0x55e   :  { %1565 = vmatmul.bf16.gmra.mxu0 %v1441_v16  ;;  %1614 = vmatmul.bf16.gmra.mxu1 %v1441_v16  ;;  %v1394_v6 = vadd.f32 %v1378_v32, %v1282_v5  ;;  %v3209_v16 = vpop.permute.xlu0 %1357 }
 0x55f   :  { %3730 = vst [vmem:[#allocation15_spill] sm:$0xff] %v3209_v16  ;;  %v1383_v32 = vmul.f32 %v3209_v16, %v2957_v24 }
 0x560   :  { %v1414_v14 = vadd.f32 %v3135_v44, %v1394_v6 }
 0x562   :  { %v1430_v50 = vmax.f32 %v1414_v14, 0.0 }
 0x563   :  { %v1256_v59 = vpop.f32.mrf.mxu3 }
 0x564   :  { %v1283_v42 = vmul.f32 %v1256_v59, %v2977_v9 }
 0x566   :  { %v1395_v1 = vadd.f32 %v1379_v61, %v1283_v42 }
 0x568   :  { %v1415_v37 = vadd.f32 %v3135_v44, %v1395_v1 }
 0x56a   :  { %v1431_v47 = vmax.f32 %v1415_v37, 0.0 }
 0x56b   :  { %v1259_v20 = vpop.f32.mrf.mxu3 }
 0x56c   :  { %v1442_v51 = vpack.c.bf16 %v1431_v47, %v1430_v50  ;;  %v1284_v0 = vmul.f32 %v1259_v20, %v2963_v27  ;;  %v3217_v47 = vpop.permute.xlu1 %1362 }
 0x56d   :  { %3731 = vst [vmem:[#allocation16_spill] sm:$0xff] %v3217_v47  ;;  %v1384_v24 = vmul.f32 %v3217_v47, %v2965_v49 }
 0x56e   :  { %1570 = vmatmul.bf16.gmra.mxu0 %v1442_v51  ;;  %1619 = vmatmul.bf16.gmra.mxu1 %v1442_v51  ;;  %v1396_v55 = vadd.f32 %v1380_v33, %v1284_v0  ;;  %v3221_v51 = vpop.permute.xlu2 %1367 }
 0x56f   :  { %3732 = vst [vmem:[#allocation17_spill] sm:$0xff] %v3221_v51  ;;  %v1385_v33 = vmul.f32 %v3221_v51, %v2971_v54 }
 0x570   :  { %v1416_v29 = vadd.f32 %v3135_v44, %v1396_v55 }
 0x572   :  { %v1432_v40 = vmax.f32 %v1416_v29, 0.0 }
 0x573   :  { %v1261_v63 = vpop.f32.mrf.mxu3 }
 0x574   :  { %v1285_v56 = vmul.f32 %v1261_v63, %v2969_v30 }
 0x576   :  { %v1397_v58 = vadd.f32 %v1381_v62, %v1285_v56 }
 0x578   :  { %v1417_v10 = vadd.f32 %v3135_v44, %v1397_v58 }
 0x57a   :  { %v1433_v12 = vmax.f32 %v1417_v10, 0.0 }
 0x57b   :  { %v1264_v41 = vpop.f32.mrf.mxu3 }
 0x57c   :  { %v1443_v35 = vpack.c.bf16 %v1433_v12, %v1432_v40  ;;  %v1286_v3 = vmul.f32 %v1264_v41, %v2961_v25 }
 0x57e   :  { %1575 = vmatmul.bf16.gmra.mxu0 %v1443_v35  ;;  %1624 = vmatmul.bf16.gmra.mxu1 %v1443_v35  ;;  %v1398_v21 = vadd.f32 %v1382_v11, %v1286_v3 }
 0x580   :  { %v1418_v59 = vadd.f32 %v3135_v44, %v1398_v21 }
 0x582   :  { %v1434_v14 = vmax.f32 %v1418_v59, 0.0 }
 0x583   :  { %v1266_v5 = vpop.f32.mrf.mxu3 }
 0x584   :  { %v1287_v6 = vmul.f32 %v1266_v5, %v2959_v8 }
 0x586   :  { %v1399_v61 = vadd.f32 %v1383_v32, %v1287_v6 }
 0x588   :  { %v1419_v42 = vadd.f32 %v3135_v44, %v1399_v61 }
 0x58a   :  { %v1435_v1 = vmax.f32 %v1419_v42, 0.0 }
 0x58b   :  { %v1269_v37 = vpop.f32.mrf.mxu3 }
 0x58c   :  { %v1444_v50 = vpack.c.bf16 %v1435_v1, %v1434_v14  ;;  %v1288_v19 = vmul.f32 %v1269_v37, %v2951_v7 }
 0x58e   :  { %1580 = vmatmul.bf16.gmra.mxu0 %v1444_v50  ;;  %1629 = vmatmul.bf16.gmra.mxu1 %v1444_v50  ;;  %v1400_v20 = vadd.f32 %v1384_v24, %v1288_v19 }
 0x590   :  { %v1420_v63 = vadd.f32 %v3135_v44, %v1400_v20 }
 0x592   :  { %v1436_v29 = vmax.f32 %v1420_v63, 0.0 }
 0x593   :  { %v1271_v0 = vpop.f32.mrf.mxu3 }
 0x594   :  { %v1289_v55 = vmul.f32 %v1271_v0, %v2955_v22 }
 0x596   :  { %v1401_v62 = vadd.f32 %v1385_v33, %v1289_v55 }
 0x598   :  { %v1421_v56 = vadd.f32 %v3135_v44, %v1401_v62 }
 0x59a   :  { %v1437_v58 = vmax.f32 %v1421_v56, 0.0 }
 0x59c   :  { %v1445_v10 = vpack.c.bf16 %v1437_v58, %v1436_v29 }
 0x59e   :  { %1585 = vmatmul.bf16.gmra.mxu0 %v1445_v10  ;;  %1634 = vmatmul.bf16.gmra.mxu1 %v1445_v10 }
 0x5ab   :  { %v3228_v49 = vpop.f32.mrf.mxu0  ;;  %v3230_v40 = vpop.f32.mrf.mxu1 }
 0x5ac   :  { %v3238_v54 = vmul.f32 %v3228_v49, %v3019_v31  ;;  %v3242_v44 = vmul.f32 %v3230_v40, %v3019_v31 }
 0x5b3   :  { %v3232_v12 = vpop.f32.mrf.mxu0  ;;  %v3234_v41 = vpop.f32.mrf.mxu1 }
 0x5b4   :  { %v3246_v35 = vmul.f32 %v3232_v12, %v3015_v43  ;;  %v3250_v3 = vmul.f32 %v3234_v41, %v3015_v43 }
 0x5bb   :  { %v3256_v5 = vpop.f32.mrf.mxu0  ;;  %v3258_v32 = vpop.f32.mrf.mxu1 }
 0x5bc   :  { %v3266_v61 = vmul.f32 %v3256_v5, %v2999_v36  ;;  %v3270_v42 = vmul.f32 %v3258_v32, %v2999_v36 }
 0x5c3   :  { %v3260_v6 = vpop.f32.mrf.mxu0  ;;  %v3262_v59 = vpop.f32.mrf.mxu1 }
 0x5c4   :  { %v3274_v14 = vmul.f32 %v3260_v6, %v3009_v46  ;;  %v3278_v1 = vmul.f32 %v3262_v59, %v3009_v46 }
 0x5cb   :  { %v3284_v19 = vpop.f32.mrf.mxu0  ;;  %v3286_v24 = vpop.f32.mrf.mxu1 }
 0x5cc   :  { %v3294_v33 = vmul.f32 %v3284_v19, %v2993_v13  ;;  %v3298_v55 = vmul.f32 %v3286_v24, %v2993_v13 }
 0x5d3   :  { %v3288_v20 = vpop.f32.mrf.mxu0  ;;  %v3290_v0 = vpop.f32.mrf.mxu1 }
 0x5d4   :  { %3733 = vst [vmem:[#allocation18_spill] sm:$0xff] %v3288_v20  ;;  %v3302_v63 = vmul.f32 %v3288_v20, %v3003_v15  ;;  %v3306_v62 = vmul.f32 %v3290_v0, %v3003_v15 }
 0x5d5   :  { %3734 = vst [vmem:[#allocation19_spill] sm:$0xff] %v3290_v0 }
 0x5d6   :  { %v1676_v56 = vpack.c.bf16 %v3302_v63, %v3294_v33  ;;  %v1677_v29 = vpack.c.bf16 %v3306_v62, %v3298_v55 }
 0x5db   :  { %v3312_v58 = vpop.f32.mrf.mxu0  ;;  %v3314_v10 = vpop.f32.mrf.mxu1 }
 0x5dc   :  { %3735 = vst [vmem:[#allocation20_spill] sm:$0xff] %v3312_v58  ;;  %v1652_v50 = vmul.f32 %v3312_v58, %v2987_v17  ;;  %v1653_v37 = vmul.f32 %v3314_v10, %v2987_v17 }
 0x5dd   :  { %3736 = vst [vmem:[#allocation21_spill] sm:$0xff] %v3314_v10 }
 0x5e3   :  { %v3316_v21 = vpop.f32.mrf.mxu0  ;;  %v3318_v11 = vpop.f32.mrf.mxu1 }
 0x5e4   :  { %3737 = vst [vmem:[#allocation22_spill] sm:$0xff] %v3316_v21  ;;  %v1654_v33 = vmul.f32 %v3316_v21, %v2983_v4  ;;  %v1655_v55 = vmul.f32 %v3318_v11, %v2983_v4 }
 0x5e5   :  { %3738 = vst [vmem:[#allocation23_spill] sm:$0xff] %v3318_v11 }
 0x5e6   :  { %v1678_v63 = vpack.c.bf16 %v1654_v33, %v1652_v50  ;;  %v1679_v62 = vpack.c.bf16 %v1655_v55, %v1653_v37 }
 0x5eb   :  { %v3328_v51 = vpop.f32.mrf.mxu0  ;;  %v3330_v47 = vpop.f32.mrf.mxu1 }
 0x5f3   :  { %v3332_v16 = vpop.f32.mrf.mxu0  ;;  %v3334_v18 = vpop.f32.mrf.mxu1 }
 0x5fb   :  { %v3336_v57 = vpop.f32.mrf.mxu0  ;;  %v3338_v52 = vpop.f32.mrf.mxu1 }
 0x603   :  { %v3340_v26 = vpop.f32.mrf.mxu0  ;;  %v3342_v60 = vpop.f32.mrf.mxu1 }
 0x60b   :  { %v3344_v21 = vpop.f32.mrf.mxu0  ;;  %v3346_v50 = vpop.f32.mrf.mxu1 }
 0x613   :  { %v3348_v37 = vpop.f32.mrf.mxu0  ;;  %v3350_v33 = vpop.f32.mrf.mxu1 }
 0x614   :  { %v1666_v15 = vmul.f32 %v3348_v37, %v2959_v8  ;;  %v1667_v0 = vmul.f32 %v3350_v33, %v2959_v8 }
 0x61b   :  { %v3352_v55 = vpop.f32.mrf.mxu0  ;;  %v3354_v4 = vpop.f32.mrf.mxu1 }
 0x61c   :  { %3739 = vst [vmem:[#allocation24_spill] sm:$0xff] %v3352_v55  ;;  %v1668_v17 = vmul.f32 %v3352_v55, %v2951_v7  ;;  %v1669_v10 = vmul.f32 %v3354_v4, %v2951_v7  ;;  %v1664_v55 = vmul.f32 %v3344_v21, %v2961_v25  ;;  %v1665_v7 = vmul.f32 %v3346_v50, %v2961_v25 }
 0x61d   :  { %3740 = vst [vmem:[#allocation25_spill] sm:$0xff] %v3354_v4 }
 0x61e   :  { %v1685_v4 = vpack.c.bf16 %v1667_v0, %v1665_v7  ;;  %v1657_v7 = vmul.f32 %v3330_v47, %v2967_v28 }
 0x623   :  { %v3356_v11 = vpop.f32.mrf.mxu0  ;;  %v3358_v34 = vpop.f32.mrf.mxu1 }
 0x624   :  { %3741 = vst [vmem:[#allocation26_spill] sm:$0xff] %v3356_v11  ;;  %v1670_v58 = vmul.f32 %v3356_v11, %v2955_v22  ;;  %v1671_v48 = vmul.f32 %v3358_v34, %v2955_v22  ;;  %v1662_v11 = vmul.f32 %v3340_v26, %v2969_v30  ;;  %v1663_v22 = vmul.f32 %v3342_v60, %v2969_v30 }
 0x625   :  { %3742 = vst [vmem:[#allocation27_spill] sm:$0xff] %v3358_v34  ;;  %v1684_v34 = vpack.c.bf16 %v1666_v15, %v1664_v55  ;;  %v1656_v15 = vmul.f32 %v3328_v51, %v2967_v28 }
 0x626   :  { %v1686_v20 = vpack.c.bf16 %v1670_v58, %v1668_v17  ;;  %v1687_v53 = vpack.c.bf16 %v1671_v48, %v1669_v10  ;;  %v1660_v17 = vmul.f32 %v3336_v57, %v2963_v27  ;;  %v1661_v48 = vmul.f32 %v3338_v52, %v2963_v27 }
 0x628   :  { %1688 = vmatpush.bf16.msra.mxu2 %v1686_v20  ;;  %1737 = vmatpush.bf16.msra.mxu3 %v1687_v53  ;;  %v1658_v20 = vmul.f32 %v3332_v16, %v2977_v9  ;;  %v1659_v53 = vmul.f32 %v3334_v18, %v2977_v9  ;;  %v1682_v58 = vpack.c.bf16 %v1662_v11, %v1660_v17 }
 0x629   :  { %v1683_v10 = vpack.c.bf16 %v1663_v22, %v1661_v48  ;;  %v3744_v22 = vpack.c.bf16 %v3278_v1, %v3270_v42  ;;  %v3746_v11 = vpack.c.bf16 %v3250_v3, %v3242_v44  ;;  %v2326_v44 = vld [vmem:[%s3665_s0 + $0x18] sm:$0xff]  ;;  %v2328_v3 = vld [vmem:[%s3665_s0 + $0x28] sm:$0xff]  ;;  %v2329_v42 = vld [vmem:[%s3665_s0 + $0x30] sm:$0xff] }
 0x62a   :  { %v1680_v0 = vpack.c.bf16 %v1658_v20, %v1656_v15  ;;  %v1681_v55 = vpack.c.bf16 %v1659_v53, %v1657_v7  ;;  %v1882_v1 = vld [vmem:[%s3673_s14] sm:$0x3] }
 0x62b   :  { %v3436_v20 = vperm.slane %v1882_v1, 0 }
 0x62c   :  { %1689 = vmatpush.bf16.msra.mxu2 %v1684_v34  ;;  %1738 = vmatpush.bf16.msra.mxu3 %v1685_v4  ;;  %v3743_v4 = vpack.c.bf16 %v3274_v14, %v3266_v61  ;;  %v3745_v34 = vpack.c.bf16 %v3246_v35, %v3238_v54  ;;  %v2324_v61 = vld [vmem:[%s3665_s0 + $0x8] sm:$0xff]  ;;  %v2325_v54 = vld [vmem:[%s3665_s0 + $0x10] sm:$0xff]  ;;  %v2327_v35 = vld [vmem:[%s3665_s0 + $0x20] sm:$0xff] }
 0x62d   :  { %v2330_v14 = vld [vmem:[%s3665_s0 + $0x38] sm:$0xff] }
 0x630   :  { %1690 = vmatpush.bf16.msra.mxu2 %v1682_v58  ;;  %1739 = vmatpush.bf16.msra.mxu3 %v1683_v10  ;;  %v3439_v58 = vperm.slane %v1882_v1, 1 }
 0x634   :  { %1691 = vmatpush.bf16.msra.mxu2 %v1680_v0  ;;  %1740 = vmatpush.bf16.msra.mxu3 %v1681_v55 }
 0x638   :  { %1692 = vmatpush.bf16.msra.mxu2 %v1678_v63  ;;  %1741 = vmatpush.bf16.msra.mxu3 %v1679_v62  ;;  %v1819_v63 = vmul.f32 %v3230_v40, %v3128_v2  ;;  %v1821_v40 = vmul.f32 %v3234_v41, %v3137_v45  ;;  %v1822_v41 = vmul.f32 %v3256_v5, %v3145_v23 }
 0x63c   :  { %1693 = vmatpush.bf16.msra.mxu2 %v1676_v56  ;;  %1742 = vmatpush.bf16.msra.mxu3 %v1677_v29  ;;  %v2323_v56 = vld [vmem:[%s3665_s0] sm:$0xff]  ;;  %v1818_v29 = vmul.f32 %v3228_v49, %v3128_v2 }
 0x640   :  { %1694 = vmatpush.bf16.msra.mxu2 %v3743_v4  ;;  %1743 = vmatpush.bf16.msra.mxu3 %v3744_v22 }
 0x644   :  { %1695 = vmatpush.bf16.msra.mxu2 %v3745_v34  ;;  %1744 = vmatpush.bf16.msra.mxu3 %v3746_v11 }
 0x647   :  { %1696 = vmatmul.bf16.vlgmr.msra.gmra.mxu2 %v2323_v56  ;;  %1745 = vmatmul.bf16.vlgmr.msra.gmra.mxu3 %v2323_v56 }
 0x657   :  { %1701 = vmatmul.bf16.gmra.mxu2 %v2324_v61  ;;  %1750 = vmatmul.bf16.gmra.mxu3 %v2324_v61 }
 0x667   :  { %1706 = vmatmul.bf16.gmra.mxu2 %v2325_v54  ;;  %1755 = vmatmul.bf16.gmra.mxu3 %v2325_v54 }
 0x677   :  { %1711 = vmatmul.bf16.gmra.mxu2 %v2326_v44  ;;  %1760 = vmatmul.bf16.gmra.mxu3 %v2326_v44 }
 0x687   :  { %1716 = vmatmul.bf16.gmra.mxu2 %v2327_v35  ;;  %1765 = vmatmul.bf16.gmra.mxu3 %v2327_v35 }
 0x697   :  { %1721 = vmatmul.bf16.gmra.mxu2 %v2328_v3  ;;  %1770 = vmatmul.bf16.gmra.mxu3 %v2328_v3 }
 0x6a7   :  { %1726 = vmatmul.bf16.gmra.mxu2 %v2329_v42  ;;  %1775 = vmatmul.bf16.gmra.mxu3 %v2329_v42 }
 0x6b7   :  { %1731 = vmatmul.bf16.gmra.mxu2 %v2330_v14  ;;  %1780 = vmatmul.bf16.gmra.mxu3 %v2330_v14 }
 0x6ca   :  { %v1697_v62 = vpop.f32.mrf.mxu2  ;;  %v1746_v17 = vpop.f32.mrf.mxu3 }
 0x6cb   :  { %v1786_v48 = vmul.f32 %v1697_v62, %v3019_v31  ;;  %v1787_v53 = vmul.f32 %v1746_v17, %v3019_v31  ;;  %v1820_v31 = vmul.f32 %v3232_v12, %v3137_v45 }
 0x6cd   :  { %v1850_v10 = vadd.f32 %v1818_v29, %v1786_v48  ;;  %v1851_v15 = vadd.f32 %v1819_v63, %v1787_v53 }
 0x6cf   :  { %v1888_v7 = vadd.f32 %v3436_v20, %v1850_v10  ;;  %v1889_v0 = vadd.f32 %v3439_v58, %v1851_v15 }
 0x6d1   :  { %1920 = vst [vmem:[%s3674_s15] sm:$0xff] %v1888_v7 }
 0x6d2   :  { %1921 = vst [vmem:[%s3674_s15 + $0x8] sm:$0xff] %v1889_v0  ;;  %v1699_v2 = vpop.f32.mrf.mxu2  ;;  %v1748_v49 = vpop.f32.mrf.mxu3 }
 0x6d3   :  { %v1788_v55 = vmul.f32 %v1699_v2, %v3015_v43  ;;  %v1789_v4 = vmul.f32 %v1748_v49, %v3015_v43  ;;  %v1823_v43 = vmul.f32 %v3258_v32, %v3145_v23  ;;  %v1824_v32 = vmul.f32 %v3260_v6, %v3149_v38  ;;  %v3748_v2 = vld [vmem:[#allocation18_spill] sm:$0xff] }
 0x6d5   :  { %v1852_v22 = vadd.f32 %v1820_v31, %v1788_v55  ;;  %v1853_v34 = vadd.f32 %v1821_v40, %v1789_v4  ;;  %v3750_v40 = vld [vmem:[#allocation6_spill] sm:$0xff] }
 0x6d7   :  { %v1890_v11 = vadd.f32 %v3436_v20, %v1852_v22  ;;  %v1891_v56 = vadd.f32 %v3439_v58, %v1853_v34 }
 0x6d9   :  { %1922 = vst [vmem:[%s3674_s15 + $0x10] sm:$0xff] %v1890_v11 }
 0x6da   :  { %1923 = vst [vmem:[%s3674_s15 + $0x18] sm:$0xff] %v1891_v56  ;;  %v1702_v12 = vpop.f32.mrf.mxu2  ;;  %v1751_v45 = vpop.f32.mrf.mxu3 }
 0x6db   :  { %v1790_v61 = vmul.f32 %v1702_v12, %v2999_v36  ;;  %v1791_v54 = vmul.f32 %v1751_v45, %v2999_v36  ;;  %v1825_v36 = vmul.f32 %v3262_v59, %v3149_v38  ;;  %v1826_v59 = vmul.f32 %v3284_v19, %v3157_v39 }
 0x6dd   :  { %v1854_v44 = vadd.f32 %v1822_v41, %v1790_v61  ;;  %v1855_v35 = vadd.f32 %v1823_v43, %v1791_v54  ;;  %v3751_v41 = vld [vmem:[#allocation8_spill] sm:$0xff]  ;;  %v3753_v54 = vld [vmem:[#allocation21_spill] sm:$0xff] }
 0x6de   :  { %v3752_v43 = vld [vmem:[#allocation20_spill] sm:$0xff] }
 0x6df   :  { %v1892_v3 = vadd.f32 %v3436_v20, %v1854_v44  ;;  %v1893_v42 = vadd.f32 %v3439_v58, %v1855_v35  ;;  %v1830_v61 = vmul.f32 %v3752_v43, %v3751_v41  ;;  %v1831_v44 = vmul.f32 %v3753_v54, %v3751_v41  ;;  %v3754_v35 = vld [vmem:[#allocation5_spill] sm:$0xff]  ;;  %v3761_v43 = vld [vmem:[#allocation12_spill] sm:$0xff] }
 0x6e1   :  { %1924 = vst [vmem:[%s3674_s15 + $0x20] sm:$0xff] %v1892_v3 }
 0x6e2   :  { %1925 = vst [vmem:[%s3674_s15 + $0x28] sm:$0xff] %v1893_v42  ;;  %v1704_v5 = vpop.f32.mrf.mxu2  ;;  %v1753_v23 = vpop.f32.mrf.mxu3 }
 0x6e3   :  { %v1792_v14 = vmul.f32 %v1704_v5, %v3009_v46  ;;  %v1793_v1 = vmul.f32 %v1753_v23, %v3009_v46  ;;  %v1827_v46 = vmul.f32 %v3286_v24, %v3157_v39  ;;  %v3747_v24 = vld [vmem:[#allocation7_spill] sm:$0xff] }
 0x6e4   :  { %v1828_v49 = vmul.f32 %v3748_v2, %v3747_v24 }
 0x6e5   :  { %v1856_v29 = vadd.f32 %v1824_v32, %v1792_v14  ;;  %v1857_v63 = vadd.f32 %v1825_v36, %v1793_v1 }
 0x6e7   :  { %v1894_v62 = vadd.f32 %v3436_v20, %v1856_v29  ;;  %v1895_v17 = vadd.f32 %v3439_v58, %v1857_v63  ;;  %v3755_v29 = vld [vmem:[#allocation9_spill] sm:$0xff]  ;;  %v3756_v63 = vld [vmem:[#allocation22_spill] sm:$0xff] }
 0x6e9   :  { %1926 = vst [vmem:[%s3674_s15 + $0x30] sm:$0xff] %v1894_v62  ;;  %v1832_v62 = vmul.f32 %v3756_v63, %v3755_v29 }
 0x6ea   :  { %1927 = vst [vmem:[%s3674_s15 + $0x38] sm:$0xff] %v1895_v17  ;;  %v1707_v6 = vpop.f32.mrf.mxu2  ;;  %v1756_v38 = vpop.f32.mrf.mxu3  ;;  %v3757_v17 = vld [vmem:[#allocation23_spill] sm:$0xff] }
 0x6eb   :  { %v1794_v48 = vmul.f32 %v1707_v6, %v2993_v13  ;;  %v1795_v53 = vmul.f32 %v1756_v38, %v2993_v13  ;;  %v3749_v13 = vld [vmem:[#allocation19_spill] sm:$0xff]  ;;  %v1833_v6 = vmul.f32 %v3757_v17, %v3755_v29  ;;  %v3758_v38 = vld [vmem:[#allocation4_spill] sm:$0xff]  ;;  %v3763_v17 = vld [vmem:[#allocation14_spill] sm:$0xff] }
 0x6ec   :  { %v1829_v31 = vmul.f32 %v3749_v13, %v3747_v24 }
 0x6ed   :  { %v1858_v10 = vadd.f32 %v1826_v59, %v1794_v48  ;;  %v1859_v15 = vadd.f32 %v1827_v46, %v1795_v53 }
 0x6ef   :  { %v1896_v7 = vadd.f32 %v3436_v20, %v1858_v10  ;;  %v1897_v0 = vadd.f32 %v3439_v58, %v1859_v15 }
 0x6f1   :  { %1928 = vst [vmem:[%s3674_s15 + $0x40] sm:$0xff] %v1896_v7 }
 0x6f2   :  { %1929 = vst [vmem:[%s3674_s15 + $0x48] sm:$0xff] %v1897_v0  ;;  %v1709_v19 = vpop.f32.mrf.mxu2  ;;  %v1758_v39 = vpop.f32.mrf.mxu3 }
 0x6f3   :  { %v1796_v55 = vmul.f32 %v1709_v19, %v3750_v40  ;;  %v1797_v4 = vmul.f32 %v1758_v39, %v3750_v40  ;;  %v3759_v19 = vld [vmem:[#allocation10_spill] sm:$0xff] }
 0x6f4   :  { %v1834_v39 = vmul.f32 %v3328_v51, %v3759_v19  ;;  %v1835_v24 = vmul.f32 %v3330_v47, %v3759_v19 }
 0x6f5   :  { %v1860_v22 = vadd.f32 %v1828_v49, %v1796_v55  ;;  %v1861_v34 = vadd.f32 %v1829_v31, %v1797_v4  ;;  %v3760_v4 = vld [vmem:[#allocation11_spill] sm:$0xff] }
 0x6f7   :  { %v1898_v11 = vadd.f32 %v3436_v20, %v1860_v22  ;;  %v1899_v56 = vadd.f32 %v3439_v58, %v1861_v34  ;;  %v1836_v22 = vmul.f32 %v3332_v16, %v3760_v4 }
 0x6f9   :  { %1930 = vst [vmem:[%s3674_s15 + $0x50] sm:$0xff] %v1898_v11 }
 0x6fa   :  { %1931 = vst [vmem:[%s3674_s15 + $0x58] sm:$0xff] %v1899_v56  ;;  %v1712_v12 = vpop.f32.mrf.mxu2  ;;  %v1761_v45 = vpop.f32.mrf.mxu3 }
 0x6fb   :  { %v1798_v3 = vmul.f32 %v1712_v12, %v3754_v35  ;;  %v1799_v42 = vmul.f32 %v1761_v45, %v3754_v35 }
 0x6fd   :  { %v1862_v5 = vadd.f32 %v1830_v61, %v1798_v3  ;;  %v1863_v23 = vadd.f32 %v1831_v44, %v1799_v42  ;;  %v1838_v61 = vmul.f32 %v3336_v57, %v3761_v43 }
 0x6ff   :  { %v1900_v32 = vadd.f32 %v3436_v20, %v1862_v5  ;;  %v1901_v36 = vadd.f32 %v3439_v58, %v1863_v23  ;;  %v3762_v23 = vld [vmem:[#allocation13_spill] sm:$0xff] }
 0x701   :  { %1932 = vst [vmem:[%s3674_s15 + $0x60] sm:$0xff] %v1900_v32  ;;  %v1840_v32 = vmul.f32 %v3340_v26, %v3762_v23 }
 0x702   :  { %1933 = vst [vmem:[%s3674_s15 + $0x68] sm:$0xff] %v1901_v36  ;;  %v1714_v14 = vpop.f32.mrf.mxu2  ;;  %v1763_v1 = vpop.f32.mrf.mxu3 }
 0x703   :  { %v1800_v59 = vmul.f32 %v1714_v14, %v3758_v38  ;;  %v1801_v46 = vmul.f32 %v1763_v1, %v3758_v38 }
 0x705   :  { %v1864_v48 = vadd.f32 %v1832_v62, %v1800_v59  ;;  %v1865_v53 = vadd.f32 %v1833_v6, %v1801_v46  ;;  %v1842_v6 = vmul.f32 %v3344_v21, %v3763_v17 }
 0x707   :  { %v1902_v10 = vadd.f32 %v3436_v20, %v1864_v48  ;;  %v1903_v15 = vadd.f32 %v3439_v58, %v1865_v53 }
 0x709   :  { %1934 = vst [vmem:[%s3674_s15 + $0x70] sm:$0xff] %v1902_v10 }
 0x70a   :  { %1935 = vst [vmem:[%s3674_s15 + $0x78] sm:$0xff] %v1903_v15  ;;  %v1717_v7 = vpop.f32.mrf.mxu2  ;;  %v1766_v0 = vpop.f32.mrf.mxu3  ;;  %v3764_v15 = vld [vmem:[#allocation15_spill] sm:$0xff] }
 0x70b   :  { %v1802_v2 = vmul.f32 %v1717_v7, %v2967_v28  ;;  %v1803_v49 = vmul.f32 %v1766_v0, %v2967_v28  ;;  %v1837_v28 = vmul.f32 %v3334_v18, %v3760_v4  ;;  %v1844_v7 = vmul.f32 %v3348_v37, %v3764_v15 }
 0x70d   :  { %v1866_v13 = vadd.f32 %v1834_v39, %v1802_v2  ;;  %v1867_v31 = vadd.f32 %v1835_v24, %v1803_v49 }
 0x70f   :  { %v1904_v40 = vadd.f32 %v3436_v20, %v1866_v13  ;;  %v1905_v55 = vadd.f32 %v3439_v58, %v1867_v31  ;;  %v3765_v13 = vld [vmem:[#allocation16_spill] sm:$0xff] }
 0x710   :  { %v3766_v31 = vld [vmem:[#allocation24_spill] sm:$0xff] }
 0x711   :  { %1936 = vst [vmem:[%s3674_s15 + $0x80] sm:$0xff] %v1904_v40  ;;  %v1846_v40 = vmul.f32 %v3766_v31, %v3765_v13 }
 0x712   :  { %1937 = vst [vmem:[%s3674_s15 + $0x88] sm:$0xff] %v1905_v55  ;;  %v1719_v51 = vpop.f32.mrf.mxu2  ;;  %v1768_v47 = vpop.f32.mrf.mxu3 }
 0x713   :  { %v1804_v34 = vmul.f32 %v1719_v51, %v2977_v9  ;;  %v1805_v11 = vmul.f32 %v1768_v47, %v2977_v9  ;;  %v1839_v9 = vmul.f32 %v3338_v52, %v3761_v43  ;;  %v3768_v51 = vld [vmem:[#allocation2_spill] sm:$0xff] }
 0x715   :  { %v1868_v56 = vadd.f32 %v1836_v22, %v1804_v34  ;;  %v1869_v12 = vadd.f32 %v1837_v28, %v1805_v11 }
 0x717   :  { %v1906_v45 = vadd.f32 %v3436_v20, %v1868_v56  ;;  %v1907_v41 = vadd.f32 %v3439_v58, %v1869_v12 }
 0x719   :  { %1938 = vst [vmem:[%s3674_s15 + $0x90] sm:$0xff] %v1906_v45  ;;  %v3769_v45 = vld [vmem:[#allocation17_spill] sm:$0xff] }
 0x71a   :  { %1939 = vst [vmem:[%s3674_s15 + $0x98] sm:$0xff] %v1907_v41  ;;  %v1722_v16 = vpop.f32.mrf.mxu2  ;;  %v1771_v18 = vpop.f32.mrf.mxu3  ;;  %v3770_v41 = vld [vmem:[#allocation26_spill] sm:$0xff] }
 0x71b   :  { %v1806_v54 = vmul.f32 %v1722_v16, %v2963_v27  ;;  %v1807_v44 = vmul.f32 %v1771_v18, %v2963_v27  ;;  %v1841_v27 = vmul.f32 %v3342_v60, %v3762_v23  ;;  %v1848_v16 = vmul.f32 %v3770_v41, %v3769_v45  ;;  %v3771_v18 = vld [vmem:[#allocation27_spill] sm:$0xff] }
 0x71c   :  { %v1849_v43 = vmul.f32 %v3771_v18, %v3769_v45 }
 0x71d   :  { %v1870_v35 = vadd.f32 %v1838_v61, %v1806_v54  ;;  %v1871_v3 = vadd.f32 %v1839_v9, %v1807_v44  ;;  %v3772_v61 = vld [vmem:[#allocation3_spill] sm:$0xff] }
 0x71f   :  { %v1908_v42 = vadd.f32 %v3436_v20, %v1870_v35  ;;  %v1909_v5 = vadd.f32 %v3439_v58, %v1871_v3 }
 0x721   :  { %1940 = vst [vmem:[%s3674_s15 + $0xa0] sm:$0xff] %v1908_v42 }
 0x722   :  { %1941 = vst [vmem:[%s3674_s15 + $0xa8] sm:$0xff] %v1909_v5  ;;  %v1724_v57 = vpop.f32.mrf.mxu2  ;;  %v1773_v52 = vpop.f32.mrf.mxu3 }
 0x723   :  { %v1808_v36 = vmul.f32 %v1724_v57, %v2969_v30  ;;  %v1809_v14 = vmul.f32 %v1773_v52, %v2969_v30  ;;  %v1843_v30 = vmul.f32 %v3346_v50, %v3763_v17 }
 0x725   :  { %v1872_v1 = vadd.f32 %v1840_v32, %v1808_v36  ;;  %v1873_v29 = vadd.f32 %v1841_v27, %v1809_v14 }
 0x727   :  { %v1910_v63 = vadd.f32 %v3436_v20, %v1872_v1  ;;  %v1911_v62 = vadd.f32 %v3439_v58, %v1873_v29 }
 0x729   :  { %1942 = vst [vmem:[%s3674_s15 + $0xb0] sm:$0xff] %v1910_v63 }
 0x72a   :  { %1943 = vst [vmem:[%s3674_s15 + $0xb8] sm:$0xff] %v1911_v62  ;;  %v1727_v26 = vpop.f32.mrf.mxu2  ;;  %v1776_v60 = vpop.f32.mrf.mxu3 }
 0x72b   :  { %v1810_v38 = vmul.f32 %v1727_v26, %v2961_v25  ;;  %v1811_v59 = vmul.f32 %v1776_v60, %v2961_v25  ;;  %v1845_v25 = vmul.f32 %v3350_v33, %v3764_v15 }
 0x72d   :  { %v1874_v46 = vadd.f32 %v1842_v6, %v1810_v38  ;;  %v1875_v48 = vadd.f32 %v1843_v30, %v1811_v59 }
 0x72f   :  { %v1912_v53 = vadd.f32 %v3436_v20, %v1874_v46  ;;  %v1913_v10 = vadd.f32 %v3439_v58, %v1875_v48 }
 0x731   :  { %1944 = vst [vmem:[%s3674_s15 + $0xc0] sm:$0xff] %v1912_v53 }
 0x732   :  { %1945 = vst [vmem:[%s3674_s15 + $0xc8] sm:$0xff] %v1913_v10  ;;  %v1729_v21 = vpop.f32.mrf.mxu2  ;;  %v1778_v50 = vpop.f32.mrf.mxu3 }
 0x733   :  { %v1812_v0 = vmul.f32 %v1729_v21, %v2959_v8  ;;  %v1813_v19 = vmul.f32 %v1778_v50, %v2959_v8  ;;  %v3767_v8 = vld [vmem:[#allocation25_spill] sm:$0xff] }
 0x734   :  { %v1847_v55 = vmul.f32 %v3767_v8, %v3765_v13 }
 0x735   :  { %v1876_v39 = vadd.f32 %v1844_v7, %v1812_v0  ;;  %v1877_v24 = vadd.f32 %v1845_v25, %v1813_v19 }
 0x737   :  { %v1914_v2 = vadd.f32 %v3436_v20, %v1876_v39  ;;  %v1915_v49 = vadd.f32 %v3439_v58, %v1877_v24 }
 0x739   :  { %1946 = vst [vmem:[%s3674_s15 + $0xd0] sm:$0xff] %v1914_v2 }
 0x73a   :  { %1947 = vst [vmem:[%s3674_s15 + $0xd8] sm:$0xff] %v1915_v49  ;;  %v1732_v37 = vpop.f32.mrf.mxu2  ;;  %v1781_v33 = vpop.f32.mrf.mxu3 }
 0x73b   :  { %v1814_v47 = vmul.f32 %v1732_v37, %v3768_v51  ;;  %v1815_v4 = vmul.f32 %v1781_v33, %v3768_v51 }
 0x73d   :  { %v1878_v22 = vadd.f32 %v1846_v40, %v1814_v47  ;;  %v1879_v28 = vadd.f32 %v1847_v55, %v1815_v4 }
 0x73f   :  { %v1916_v34 = vadd.f32 %v3436_v20, %v1878_v22  ;;  %v1917_v11 = vadd.f32 %v3439_v58, %v1879_v28 }
 0x741   :  { %1948 = vst [vmem:[%s3674_s15 + $0xe0] sm:$0xff] %v1916_v34 }
 0x742   :  { %1949 = vst [vmem:[%s3674_s15 + $0xe8] sm:$0xff] %v1917_v11  ;;  %v1734_v56 = vpop.f32.mrf.mxu2  ;;  %v1783_v12 = vpop.f32.mrf.mxu3 }
 0x743   :  { %v1816_v9 = vmul.f32 %v1734_v56, %v3772_v61  ;;  %v1817_v54 = vmul.f32 %v1783_v12, %v3772_v61 }
 0x745   :  { %v1880_v44 = vadd.f32 %v1848_v16, %v1816_v9  ;;  %v1881_v35 = vadd.f32 %v1849_v43, %v1817_v54 }
 0x747   :  { %v1918_v3 = vadd.f32 %v3436_v20, %v1880_v44  ;;  %v1919_v42 = vadd.f32 %v3439_v58, %v1881_v35 }
 0x749   :  { %1950 = vst [vmem:[%s3674_s15 + $0xf0] sm:$0xff] %v1918_v3 }
 0x74a   :  { %1951 = vst [vmem:[%s3674_s15 + $0xf8] sm:$0xff] %v1919_v42 }

</bundles_post_ra>
